<compile_context>
chip_gen: v6e
topology: v6e:2x2x1
jax: 0.10.0
libtpu: 0.0.40
codegen_flags: <defaults>
</compile_context>

<pallas_src>
import jax
import jax.numpy as jnp
from jax.experimental import pallas as pl
from jax.experimental.pallas import tpu as pltpu


# ----------------------------------------------------------------------------
# kernel
# ----------------------------------------------------------------------------
def _attention_kernel(query_ref, mem_ref, pmem_ref, im2col_ref, mask_ref,
                      wq_t_ref, wloc_ref, v_ref, ctx_ref, attw_ref):
    # Per-block shapes:
    #   query_ref  : (TB, Dq)  f32
    #   mem_ref    : (TB, T, E)   stream dtype
    #   pmem_ref   : (TB, T, A)   stream dtype
    #   im2col_ref : (TB, T, 2K)  stream dtype
    #   mask_ref   : (TB, Tp) int8, 1 = masked (padded lanes are masked)
    #   wq_t_ref   : (Dq, A) f32
    #   wloc_ref   : (2K, A) stream dtype (folded conv + dense)
    #   v_ref      : (1, A)  f32
    #   ctx_ref    : (TB, E)  f32
    #   attw_ref   : (TB, Tp) f32
    TB, T, A = pmem_ref.shape
    Tp = mask_ref.shape[1]
    CK = im2col_ref.shape[-1]

    # processed query: one (TB, Dq) @ (Dq, A) MXU matmul for the whole block
    pq = jnp.dot(query_ref[...], wq_t_ref[...],
                 preferred_element_type=jnp.float32)                # (TB, A)

    # folded location conv + location dense: (TB*T, 2K) @ (2K, A)
    x2 = im2col_ref[...].reshape(TB * T, CK)
    loc = jnp.dot(x2, wloc_ref[...],
                  preferred_element_type=jnp.float32).reshape(TB, T, A)

    pre = jnp.tanh(pq[:, None, :] + loc
                   + pmem_ref[...].astype(jnp.float32))             # (TB, T, A)

    # energies = v . tanh(...)  -> VPU mul + lane (XLU) reduce
    e = jnp.sum(pre * v_ref[...], axis=-1)                          # (TB, T) f32

    # widen to the lane-dense width Tp (padded columns are masked below)
    if Tp != T:
        e = jnp.concatenate(
            [e, jnp.zeros((TB, Tp - T), jnp.float32)], axis=1)      # (TB, Tp)

    # masked_fill(mask, -inf); matches the module's score_mask_value = -inf
    # (a fully-masked row yields NaN, same as the PyTorch module)
    e = jnp.where(mask_ref[...] != 0, -jnp.inf, e)

    # softmax over the (lane-dense) T axis
    m = jnp.max(e, axis=-1, keepdims=True)
    p = jnp.exp(e - m)
    w = p / jnp.sum(p, axis=-1, keepdims=True)                      # (TB, Tp)

    attw_ref[...] = w.astype(attw_ref.dtype)

    # attention_context: single batched (1,T)@(T,E) dot_general over the block
    w_c = (w[:, :T] if Tp != T else w).astype(mem_ref.dtype)        # (TB, T)
    ctx = jax.lax.dot_general(
        w_c[:, None, :], mem_ref[...],
        dimension_numbers=(((2,), (1,)), ((0,), (0,))),
        preferred_element_type=jnp.float32)                         # (TB, 1, E)
    ctx_ref[...] = ctx[:, 0, :].astype(ctx_ref.dtype)


# ----------------------------------------------------------------------------
# block-size / VMEM budgeting
# ----------------------------------------------------------------------------
def _pick_block(B, T, Tp, Dq, E, A, CK, stream_bytes, block_b):
    """Pick TB (a divisor of B, multiple of 8 or == B) from the VMEM budget."""
    try:
        cap = int(pltpu.get_tpu_info().vmem_capacity_bytes)
    except Exception:
        cap = 64 * 1024 * 1024          # conservative fallback (v7x physical)

    weight_bytes = (Dq * A + CK * A + A) * 4
    # per-batch-row bytes: double-buffered streamed blocks + f32 intermediates
    io_row = (T * (E + A + CK)) * stream_bytes + Tp + Dq * 4 + (E + Tp) * 4
    tmp_row = (3 * T * A + 4 * Tp) * 4   # loc / pre / pmem-f32 + softmax temps
    per_row = 2 * io_row + tmp_row

    budget = int(cap * 0.70) - weight_bytes - (2 << 20)
    tb_budget = max(1, budget // per_row)

    cands = sorted(d for d in range(1, B + 1)
                   if B % d == 0 and (d % 8 == 0 or d == B))
    if block_b is not None and block_b in cands:
        tb = block_b
    else:
        fit = [d for d in cands if d <= tb_budget]
        if not fit:
            tb = cands[0]                # best effort for pathologically long T
        else:
            # prefer >= 2 grid steps: feeds both TensorCores on v7x, enables
            # DMA/compute overlap; harmless on v5e/v6e.
            multi = [d for d in fit if d <= B // 2]
            tb = max(multi) if multi else max(fit)

    need = tb * per_row + weight_bytes + (2 << 20)
    vmem_limit = int(min(cap * 0.92, max(need * 1.25, 32 * 1024 * 1024)))
    return tb, vmem_limit


def _const_spec(shape):
    """BlockSpec for a grid-invariant (weight) input; single-buffered if supported."""
    idx = lambda b: (0,) * len(shape)
    if hasattr(pl, "Buffered"):
        try:
            return pl.BlockSpec(shape, idx, pipeline_mode=pl.Buffered(1))
        except TypeError:
            pass
    return pl.BlockSpec(shape, idx)


# ----------------------------------------------------------------------------
# wrapper
# ----------------------------------------------------------------------------
def attention_forward(query, memory, processed_memory, attention_weights_cat,
                      mask, wq, wconv, wdense, wv, *, block_b=None,
                      stream_dtype=jnp.bfloat16):
    """query:(B,Dq)  memory:(B,T,E)  processed_memory:(B,T,A)
       attention_weights_cat:(B,2,T)  mask:(B,T) bool
       wq:(A,Dq)  wconv:(F,2,K)  wdense:(A,F)  wv:(1,A)
       stream_dtype: dtype of the large HBM streams (default bf16);
       accumulation is always f32.  Use jnp.float32 for bit-exact f32."""
    B, T, E = memory.shape
    A = processed_memory.shape[-1]
    Dq = query.shape[-1]
    F_n, _, K = wconv.shape
    P = (K - 1) // 2
    CK = 2 * K
    Tp = ((T + 127) // 128) * 128        # lane-dense width for mask/energies/attw

    sdt = jnp.dtype(stream_dtype) if stream_dtype is not None else memory.dtype

    # ---- one-time weight folding (tiny, plain XLA glue) -------------------
    wq_t = wq.T.astype(jnp.float32)                                  # (Dq, A)
    wc_flat = jnp.transpose(wconv, (1, 2, 0)).reshape(CK, F_n)       # [(c*K+k), F]
    w_loc = (wc_flat.astype(jnp.float32)
             @ wdense.T.astype(jnp.float32)).astype(sdt)             # (2K, A)
    v_row = wv.astype(jnp.float32).reshape(1, A)                     # (1, A)

    # ---- im2col of attention_weights_cat: (B, T, 2K), streamed narrow -----
    awc = attention_weights_cat.astype(jnp.float32)
    padded = jnp.pad(awc, ((0, 0), (0, 0), (P, P)))
    cols = jnp.stack([padded[:, :, k:k + T] for k in range(K)], axis=-1)  # (B,2,T,K)
    im2col = jnp.transpose(cols, (0, 2, 1, 3)).reshape(B, T, CK).astype(sdt)

    # ---- mask: int8, lane-padded to Tp (padded columns are masked) --------
    mask_b = mask.astype(jnp.bool_)
    if Tp != T:
        mask_b = jnp.concatenate(
            [mask_b, jnp.ones((B, Tp - T), jnp.bool_)], axis=1)
    mask_i = mask_b.astype(jnp.int8)

    query_f = query.astype(jnp.float32)
    # NOTE: the big streams are cast (not copied/padded) to the stream dtype;
    # in a real decoder these casts are hoisted/amortized across decoder steps.
    mem_s = memory.astype(sdt)
    pmem_s = processed_memory.astype(sdt)

    # ---- batch blocking: TB divides B -> no padding of the big tensors ----
    TB, vmem_limit = _pick_block(B, T, Tp, Dq, E, A, CK, sdt.itemsize, block_b)
    grid = (B // TB,)

    out_shapes = (jax.ShapeDtypeStruct((B, E), jnp.float32),
                  jax.ShapeDtypeStruct((B, Tp), jnp.float32))

    grid_spec = pltpu.PrefetchScalarGridSpec(
        num_scalar_prefetch=0,
        grid=grid,
        in_specs=[
            pl.BlockSpec((TB, Dq), lambda b: (b, 0)),
            pl.BlockSpec((TB, T, E), lambda b: (b, 0, 0)),
            pl.BlockSpec((TB, T, A), lambda b: (b, 0, 0)),
            pl.BlockSpec((TB, T, CK), lambda b: (b, 0, 0)),
            pl.BlockSpec((TB, Tp), lambda b: (b, 0)),
            _const_spec((Dq, A)),
            _const_spec((CK, A)),
            _const_spec((1, A)),
        ],
        out_specs=(
            pl.BlockSpec((TB, E), lambda b: (b, 0)),
            pl.BlockSpec((TB, Tp), lambda b: (b, 0)),
        ),
    )

    ctx, attw = pl.pallas_call(
        _attention_kernel,
        out_shape=out_shapes,
        grid_spec=grid_spec,
        compiler_params=pltpu.CompilerParams(
            dimension_semantics=("parallel",),     # batch blocks are independent
            vmem_limit_bytes=vmem_limit),
    )(query_f, mem_s, pmem_s, im2col, mask_i, wq_t, w_loc, v_row)

    return ctx, attw[:, :T]


# ----------------------------------------------------------------------------
# pure-JAX reference (mirrors the PyTorch module)
# ----------------------------------------------------------------------------
def _reference(query, memory, pmem, awc, mask, wq, wconv, wdense, wv):
    pq = (query @ wq.T)[:, None, :]                            # (B,1,A)
    F_n, _, K = wconv.shape
    P = (K - 1) // 2
    B, C, T = awc.shape
    padded = jnp.pad(awc, ((0, 0), (0, 0), (P, P)))
    loc = jnp.zeros((B, F_n, T), jnp.float32)
    for k in range(K):
        loc = loc + jnp.einsum('bct,fc->bft', padded[:, :, k:k + T], wconv[:, :, k])
    loc = jnp.transpose(loc, (0, 2, 1)) @ wdense.T              # (B,T,A)
    energies = (jnp.tanh(pq + loc + pmem) @ wv.T)[..., 0]       # (B,T)
    energies = jnp.where(mask, -jnp.inf, energies)
    w = jax.nn.softmax(energies, axis=1)
    ctx = jnp.einsum('bt,bte->be', w, memory)
    return ctx, w


if __name__ == "__main__":
    # small shapes: B=16 -> TB=8 (2 grid steps), T=40 -> Tp=128 (exercises the
    # lane-padding / slicing paths)
    B, T = 16, 40
    attention_rnn_dim = 32
    embedding_dim = 64
    attention_dim = 32
    n_filters = 4
    kernel_size = 5

    key = jax.random.PRNGKey(0)
    ks = jax.random.split(key, 8)

    query = jax.random.normal(ks[0], (B, attention_rnn_dim), jnp.float32)
    memory = jax.random.normal(ks[1], (B, T, embedding_dim), jnp.float32)
    processed_memory = jax.random.normal(ks[2], (B, T, attention_dim), jnp.float32)
    attention_weights_cat = jax.random.uniform(ks[3], (B, 2, T), jnp.float32)
    lengths = T - (jnp.arange(B, dtype=jnp.int32) % 7)
    mask = jnp.arange(T)[None, :] >= lengths[:, None]           # (B, T) bool

    # deterministic parameter init (shapes from LinearNorm / ConvNorm)
    wq = 0.1 * jax.random.normal(ks[4], (attention_dim, attention_rnn_dim), jnp.float32)
    wconv = 0.1 * jax.random.normal(ks[5], (n_filters, 2, kernel_size), jnp.float32)
    wdense = 0.1 * jax.random.normal(ks[6], (attention_dim, n_filters), jnp.float32)
    wv = 0.1 * jax.random.normal(ks[7], (1, attention_dim), jnp.float32)
    # TODO(synk): memory_layer weights exist in __init__ but are unused in forward
    # (processed_memory is passed in), so they are not materialized here.

    ctx_ref, attw_ref = _reference(query, memory, processed_memory,
                                   attention_weights_cat, mask,
                                   wq, wconv, wdense, wv)

    # 1) exact f32 streaming path
    ctx32, attw32 = attention_forward(query, memory, processed_memory,
                                      attention_weights_cat, mask,
                                      wq, wconv, wdense, wv,
                                      stream_dtype=jnp.float32)
    jax.block_until_ready((ctx32, attw32))
    assert jnp.allclose(ctx32, ctx_ref, rtol=1e-4, atol=1e-5), "f32 ctx mismatch"
    assert jnp.allclose(attw32, attw_ref, rtol=1e-4, atol=1e-5), "f32 attw mismatch"

    # 2) default bf16 streaming path (f32 accumulation)
    ctx16, attw16 = attention_forward(query, memory, processed_memory,
                                      attention_weights_cat, mask,
                                      wq, wconv, wdense, wv)
    jax.block_until_ready((ctx16, attw16))
    assert jnp.allclose(ctx16, ctx_ref, rtol=2e-2, atol=2e-2), "bf16 ctx mismatch"
    assert jnp.allclose(attw16, attw_ref, rtol=2e-2, atol=2e-2), "bf16 attw mismatch"

    print("KERNEL_OK")
</pallas_src>

<mosaic_0001>
module attributes {stable_mosaic.version = 11 : i64} {
  func.func @_attention_kernel(%arg0: i32, %arg1: memref<8x32xf32, #tpu.memory_space<vmem>>, %arg2: memref<8x40x64xf32, #tpu.memory_space<vmem>>, %arg3: memref<8x40x32xf32, #tpu.memory_space<vmem>>, %arg4: memref<8x40x10xf32, #tpu.memory_space<vmem>>, %arg5: memref<8x128xi8, #tpu.memory_space<vmem>>, %arg6: memref<32x32xf32, #tpu.memory_space<vmem>>, %arg7: memref<10x32xf32, #tpu.memory_space<vmem>>, %arg8: memref<1x32xf32, #tpu.memory_space<vmem>>, %arg9: memref<8x64xf32, #tpu.memory_space<vmem>>, %arg10: memref<8x128xf32, #tpu.memory_space<vmem>>) attributes {dimension_semantics = [#tpu.dimension_semantics<parallel>], iteration_bounds = array<i64: 2>, scalar_prefetch = 0 : i64, scratch_operands = 0 : i64, tpu.core_type = #tpu.core_type<tc>, window_params = [{transform_indices = @transform_0, window_bounds = array<i64: 8, 32>}, {transform_indices = @transform_1, window_bounds = array<i64: 8, 40, 64>}, {transform_indices = @transform_2, window_bounds = array<i64: 8, 40, 32>}, {transform_indices = @transform_3, window_bounds = array<i64: 8, 40, 10>}, {transform_indices = @transform_4, window_bounds = array<i64: 8, 128>}, {pipeline_mode = #tpu.pipeline_mode<synchronous>, transform_indices = @transform_5, window_bounds = array<i64: 32, 32>}, {pipeline_mode = #tpu.pipeline_mode<synchronous>, transform_indices = @transform_6, window_bounds = array<i64: 10, 32>}, {pipeline_mode = #tpu.pipeline_mode<synchronous>, transform_indices = @transform_7, window_bounds = array<i64: 1, 32>}, {transform_indices = @transform_8, window_bounds = array<i64: 8, 64>}, {transform_indices = @transform_9, window_bounds = array<i64: 8, 128>}]} {
    %c0 = arith.constant 0 : index
    %c0_0 = arith.constant 0 : index
    %0 = vector.load %arg1[%c0, %c0_0] : memref<8x32xf32, #tpu.memory_space<vmem>>, vector<8x32xf32>
    %c0_1 = arith.constant 0 : index
    %c0_2 = arith.constant 0 : index
    %1 = vector.load %arg6[%c0_1, %c0_2] : memref<32x32xf32, #tpu.memory_space<vmem>>, vector<32x32xf32>
    %cst = arith.constant dense<0.000000e+00> : vector<8x32xf32>
    %2 = tpu.matmul %0, %1, %cst {dimension_numbers = #tpu.dot_dimension_numbers<[1], [0], [0], [1], [0, 0, 1, 1], [], []>} : vector<8x32xf32>, vector<32x32xf32>, vector<8x32xf32> -> vector<8x32xf32>
    %c0_3 = arith.constant 0 : index
    %c0_4 = arith.constant 0 : index
    %c0_5 = arith.constant 0 : index
    %3 = vector.load %arg4[%c0_3, %c0_4, %c0_5] : memref<8x40x10xf32, #tpu.memory_space<vmem>>, vector<8x40x10xf32>
    %4 = vector.shape_cast %3 : vector<8x40x10xf32> to vector<320x10xf32>
    %c0_6 = arith.constant 0 : index
    %c0_7 = arith.constant 0 : index
    %5 = vector.load %arg7[%c0_6, %c0_7] : memref<10x32xf32, #tpu.memory_space<vmem>>, vector<10x32xf32>
    %cst_8 = arith.constant dense<0.000000e+00> : vector<320x32xf32>
    %6 = tpu.matmul %4, %5, %cst_8 {dimension_numbers = #tpu.dot_dimension_numbers<[1], [0], [0], [1], [0, 0, 1, 1], [], []>} : vector<320x10xf32>, vector<10x32xf32>, vector<320x32xf32> -> vector<320x32xf32>
    %7 = vector.shape_cast %6 : vector<320x32xf32> to vector<8x40x32xf32>
    %8 = vector.shape_cast %2 : vector<8x32xf32> to vector<8x1x32xf32>
    %9 = vector.broadcast %8 : vector<8x1x32xf32> to vector<8x40x32xf32>
    %10 = arith.addf %9, %7 : vector<8x40x32xf32>
    %c0_9 = arith.constant 0 : index
    %c0_10 = arith.constant 0 : index
    %c0_11 = arith.constant 0 : index
    %11 = vector.load %arg3[%c0_9, %c0_10, %c0_11] : memref<8x40x32xf32, #tpu.memory_space<vmem>>, vector<8x40x32xf32>
    %12 = arith.addf %10, %11 : vector<8x40x32xf32>
    %13 = math.tanh %12 : vector<8x40x32xf32>
    %c0_12 = arith.constant 0 : index
    %c0_13 = arith.constant 0 : index
    %14 = vector.load %arg8[%c0_12, %c0_13] : memref<1x32xf32, #tpu.memory_space<vmem>>, vector<1x32xf32>
    %15 = vector.shape_cast %14 : vector<1x32xf32> to vector<1x1x32xf32>
    %16 = vector.broadcast %15 : vector<1x1x32xf32> to vector<8x40x32xf32>
    %17 = arith.mulf %13, %16 : vector<8x40x32xf32>
    %cst_14 = arith.constant dense<0.000000e+00> : vector<8x40xf32>
    %18 = vector.multi_reduction <add>, %17, %cst_14 [2] : vector<8x40x32xf32> to vector<8x40xf32>
    %cst_15 = arith.constant 0.000000e+00 : f32
    %19 = vector.broadcast %cst_15 : f32 to vector<8x88xf32>
    %20 = tpu.concatenate %18, %19 in 1 : vector<8x40xf32>, vector<8x88xf32> -> vector<8x128xf32>
    %c0_16 = arith.constant 0 : index
    %c0_17 = arith.constant 0 : index
    %21 = vector.load %arg5[%c0_16, %c0_17] : memref<8x128xi8, #tpu.memory_space<vmem>>, vector<8x128xi8>
    %c0_i8 = arith.constant 0 : i8
    %22 = vector.broadcast %c0_i8 : i8 to vector<8x128xi8>
    %23 = arith.cmpi ne, %21, %22 : vector<8x128xi8>
    %cst_18 = arith.constant 0xFF800000 : f32
    %24 = vector.broadcast %cst_18 : f32 to vector<8x128xf32>
    %25 = arith.select %23, %24, %20 : vector<8x128xi1>, vector<8x128xf32>
    %cst_19 = arith.constant dense<0xFF800000> : vector<8xf32>
    %26 = vector.multi_reduction <maximumf>, %25, %cst_19 [1] : vector<8x128xf32> to vector<8xf32>
    %27 = vector.shape_cast %26 : vector<8xf32> to vector<8x1xf32>
    %28 = vector.broadcast %27 : vector<8x1xf32> to vector<8x128xf32>
    %29 = arith.subf %25, %28 : vector<8x128xf32>
    %30 = math.exp %29 : vector<8x128xf32>
    %cst_20 = arith.constant dense<0.000000e+00> : vector<8xf32>
    %31 = vector.multi_reduction <add>, %30, %cst_20 [1] : vector<8x128xf32> to vector<8xf32>
    %32 = vector.shape_cast %31 : vector<8xf32> to vector<8x1xf32>
    %33 = vector.broadcast %32 : vector<8x1xf32> to vector<8x128xf32>
    %34 = arith.divf %30, %33 : vector<8x128xf32>
    %c0_21 = arith.constant 0 : index
    %c0_22 = arith.constant 0 : index
    %35 = vector.load %arg10[%c0_21, %c0_22] : memref<8x128xf32, #tpu.memory_space<vmem>>, vector<8x128xf32>
    tpu.vector_store %arg10[%c0_21, %c0_22], %34 {strides = array<i32>} : memref<8x128xf32, #tpu.memory_space<vmem>>, vector<8x128xf32>,
    %36 = vector.extract_strided_slice %34 {offsets = [0, 0], sizes = [8, 40], strides = [1, 1]} : vector<8x128xf32> to vector<8x40xf32>
    %37 = vector.shape_cast %36 : vector<8x40xf32> to vector<8x1x40xf32>
    %c0_23 = arith.constant 0 : index
    %c0_24 = arith.constant 0 : index
    %c0_25 = arith.constant 0 : index
    %38 = vector.load %arg2[%c0_23, %c0_24, %c0_25] : memref<8x40x64xf32, #tpu.memory_space<vmem>>, vector<8x40x64xf32>
    %cst_26 = arith.constant dense<0.000000e+00> : vector<8x1x64xf32>
    %39 = tpu.matmul %37, %38, %cst_26 {dimension_numbers = #tpu.dot_dimension_numbers<[2], [1], [1], [2], [0, 0, 0, 1, 1, 2], [0], [0]>} : vector<8x1x40xf32>, vector<8x40x64xf32>, vector<8x1x64xf32> -> vector<8x1x64xf32>
    %40 = vector.shape_cast %39 : vector<8x1x64xf32> to vector<8x64xf32>
    %c0_27 = arith.constant 0 : index
    %c0_28 = arith.constant 0 : index
    %41 = vector.load %arg9[%c0_27, %c0_28] : memref<8x64xf32, #tpu.memory_space<vmem>>, vector<8x64xf32>
    tpu.vector_store %arg9[%c0_27, %c0_28], %40 {strides = array<i32>} : memref<8x64xf32, #tpu.memory_space<vmem>>, vector<8x64xf32>,
    return
  }
  func.func @transform_0(%arg0: i32) -> (i32, i32) {
    %c0_i32 = arith.constant 0 : i32
    %c0_i32_0 = arith.constant 0 : i32
    return %arg0, %c0_i32 : i32, i32
  }
  func.func @transform_1(%arg0: i32) -> (i32, i32, i32) {
    %c0_i32 = arith.constant 0 : i32
    %c0_i32_0 = arith.constant 0 : i32
    %c0_i32_1 = arith.constant 0 : i32
    return %arg0, %c0_i32, %c0_i32_0 : i32, i32, i32
  }
  func.func @transform_2(%arg0: i32) -> (i32, i32, i32) {
    %c0_i32 = arith.constant 0 : i32
    %c0_i32_0 = arith.constant 0 : i32
    %c0_i32_1 = arith.constant 0 : i32
    return %arg0, %c0_i32, %c0_i32_0 : i32, i32, i32
  }
  func.func @transform_3(%arg0: i32) -> (i32, i32, i32) {
    %c0_i32 = arith.constant 0 : i32
    %c0_i32_0 = arith.constant 0 : i32
    %c0_i32_1 = arith.constant 0 : i32
    return %arg0, %c0_i32, %c0_i32_0 : i32, i32, i32
  }
  func.func @transform_4(%arg0: i32) -> (i32, i32) {
    %c0_i32 = arith.constant 0 : i32
    %c0_i32_0 = arith.constant 0 : i32
    return %arg0, %c0_i32 : i32, i32
  }
  func.func @transform_5(%arg0: i32) -> (i32, i32) {
    %c0_i32 = arith.constant 0 : i32
    %c0_i32_0 = arith.constant 0 : i32
    %c0_i32_1 = arith.constant 0 : i32
    return %c0_i32, %c0_i32_0 : i32, i32
  }
  func.func @transform_6(%arg0: i32) -> (i32, i32) {
    %c0_i32 = arith.constant 0 : i32
    %c0_i32_0 = arith.constant 0 : i32
    %c0_i32_1 = arith.constant 0 : i32
    return %c0_i32, %c0_i32_0 : i32, i32
  }
  func.func @transform_7(%arg0: i32) -> (i32, i32) {
    %c0_i32 = arith.constant 0 : i32
    %c0_i32_0 = arith.constant 0 : i32
    %c0_i32_1 = arith.constant 0 : i32
    return %c0_i32, %c0_i32_0 : i32, i32
  }
  func.func @transform_8(%arg0: i32) -> (i32, i32) {
    %c0_i32 = arith.constant 0 : i32
    %c0_i32_0 = arith.constant 0 : i32
    return %arg0, %c0_i32 : i32, i32
  }
  func.func @transform_9(%arg0: i32) -> (i32, i32) {
    %c0_i32 = arith.constant 0 : i32
    %c0_i32_0 = arith.constant 0 : i32
    return %arg0, %c0_i32 : i32, i32
  }
}

</mosaic_0001>

<bundles_post_ra>
// kernel: tpu_custom_call.1
= control target key start
LH: loop header
LB: loop body
LE: loop exit
PB: predicated region body
PF: predicated region fallthrough
CT: control target
= control target key end

     0   :  { %s3786_s0 = inlined_call_operand.vmem [shape: f32[16,32], index: 0, kind: input, shape index: {}]   ;;  %s3787_s1 = inlined_call_operand.vmem [shape: f32[16,40,64], index: 1, kind: input, shape index: {}]   ;;  %s3788_s2 = inlined_call_operand.vmem [shape: f32[16,40,32], index: 2, kind: input, shape index: {}]   ;;  %s3789_s3 = inlined_call_operand.vmem [shape: f32[16,40,10], index: 3, kind: input, shape index: {}]   ;;  %s3790_s4 = inlined_call_operand.vmem [shape: s8[16,128], index: 4, kind: input, shape index: {}]   ;;  %s3791_s5 = inlined_call_operand.vmem [shape: f32[32,32], index: 5, kind: input, shape index: {}]   ;;  %s3792_s6 = inlined_call_operand.vmem [shape: f32[10,32], index: 6, kind: input, shape index: {}]   ;;  %s3793_s7 = inlined_call_operand.vmem [shape: f32[1,32], index: 7, kind: input, shape index: {}]   ;;  %s3794_s8 = inlined_call_operand.hbm [shape: f32[16,64], index: 8, kind: output, shape index: {0}]   ;;  %s3795_s9 = inlined_call_operand.hbm [shape: f32[16,128], index: 9, kind: output, shape index: {1}]  }
   0x1   :  { %3798 = sst [smem:[#allocation8_spill]] %s3786_s0 }
   0x2   :  { %3799 = sst [smem:[#allocation9_spill]] %s3787_s1 }
   0x3   :  { %15 = vsyncpa [#allocation3], 0 }
   0x4   :  { %17 = vsyncpa [#allocation3 + $0x1], 0 }
   0x5   :  { %18 = vsyncpa [#allocation5], 0 }
   0x6   :  { %20 = vsyncpa [#allocation5 + $0x1], 0  ;;  %s3124_s30 = smov 0   ;;  %s3126_s10 = smov 0  }
   0x7   :  { %s3128_s11 = smov 0   ;;  %s3130_s12 = smov 0  }
   0x8 LB: > { %s3145_s13 = sadd.s32 4294967295, %s3066_s12   ;;  %s2498_s14 = sadd.s32 4294967294, %s3066_s12   ;;  %s3066_s12 = sphi %s3130_s12, %s3809_s12   ;;  %s3062_s11 = sphi %s3128_s11, %s3808_s11   ;;  %s3058_s10 = sphi %s3126_s10, %s3807_s10   ;;  %s3054_s30 = sphi %s3124_s30, %s3806_s30  }
   0x9   : > { %s3149_s15 = sadd.s32 1, %s3066_s12   ;;  %s226_s16 = sadd.s32 1, %s3062_s11 }
   0xa   : > { %s223_s17 = ssub.s32 %s3066_s12, %s3149_s15  ;;  %p236_p0 = scmp.ne.s32.totalorder %s3062_s11, %s3058_s10 }
   0xb   : > { %p224_p1 = scmp.eq.s32.totalorder %s223_s17, 0  ;;  %p237_p2 = scmp.eq.s32.totalorder %s3145_s13, 1 }
   0xc   : > { %p242_p3 = scmp.ne.s32.totalorder %s3058_s10, %s3054_s30  ;;  %p243_p4 = scmp.eq.s32.totalorder %s2498_s14, 1 }
   0xd   : > { %s3160_s18 = scalar_select %p224_p1, %s3062_s11, %s226_s16  }
   0xe   : > { %p3162_p5 = por %p237_p2, %p236_p0  ;;  %p3166_p6 = por %p243_p4, %p242_p3 }
   0xf   : > { %p2501_p7 = scmp.ge.s32.totalorder %s3066_s12, 1  ;;  %p340_p8 = scmp.lt.s32.totalorder %s3066_s12, 3 }
  0x11   : > { %p341_p9 = pnand %p2501_p7, %p340_p8 }
  0x12   : > { %p402_p10 = scmp.lt.s32.totalorder (!%p341_p9), %s3145_s13, 1  ;;  %s2505_s29 = sshll.u32 (!%p341_p9), %s3145_s13, 3 }
  0x13   : > { %344 = sbr.rel (%p341_p9) target bundleno = 1060 (0x424), region = 52  ;;  %p407_p11 = scmp.lt.s32.totalorder (!%p341_p9), %s2505_s29, 15 }
  0x14   : > { %s3802_s0 = sld [smem:[#allocation8_spill]] (!%p341_p9) }
  0x15   : > { %s3803_s1 = sld [smem:[#allocation9_spill]] (!%p341_p9) }
  0x18   : > { %v437_v0 = vld [vmem:[%s3791_s5 + $0x18] sm:$0xff]  ;;  %vm675_vm0 = vcmask 1041408   ;;  %v3068_v1 = vmov 0.0   ;;  %v436_v2 = vld [vmem:[%s3791_s5 + $0x10] sm:$0xff]  ;;  %v553_v3 = vld [vmem:[%s3792_s6 + $0x8] sm:$0x3]  ;;  %v949_v50 = vlaneseq }
  0x19   : > { %2664 = vmatprep.subr.mxu0 %v3068_v1  ;;  %vm3069_vm1 = vmmov 0   ;;  %v552_v4 = vld [vmem:[%s3792_s6] sm:$0xff]  ;;  %2675 = vmatprep.subr.msk.mxu1 %vm675_vm0, %v553_v3  ;;  %v435_v5 = vld [vmem:[%s3791_s5 + $0x8] sm:$0xff]  ;;  %s3194_s17 = scalar_select %p402_p10, %s3145_s13, 1  ;;  %vm438_vm2 = vcmask 261120   ;;  %vm554_vm3 = vcmask 80896  }
  0x1a   : > { %2672 = vmatprep.mubr.msk.f32.mxu0 %vm3069_vm1, %v3068_v1  ;;  %2665 = vmatpush3.msra.mxu0 %v437_v0  ;;  %v434_v6 = vld [vmem:[%s3791_s5] sm:$0xff]  ;;  %s3811_s29 = smov (!%p407_p11, %s2505_s29), 15  ;;  %v3070_v48 = vmov 1966171168   ;;  %v3301_v52 = vshrl.u32 %v949_v50, 7  ;;  %vm1412_vm4 = vcmask 130112  }
  0x1b   : > { %2666 = vmatprep.subr.mxu0 %v3068_v1  ;;  %2676 = vmatpush3.msk.msra.mxu1 %vm675_vm0, %v553_v3  ;;  %s2504_s23 = sshll.u32 %s3194_s17, 3  ;;  %s3207_s27 = smul.u32 40, %s3811_s29  ;;  %v947_v49 = vunpack.c.l.s4 %v3070_v48  ;;  %vm1419_vm5 = vcmask 195712   ;;  %vm1426_vm6 = vcmask 261312   ;;  %vm1433_vm7 = vcmask 326912  }
  0x1c   : > { %2667 = vmatpush3.msra.mxu0 %v436_v2  ;;  %2677 = vmatprep.subr.mxu1 %v552_v4  ;;  %s405_s26 = scalar_lea.vmem %s3802_s0, %s2504_s23  ;;  %v3311_v56 = vsub.s32 0, %v3301_v52  ;;  %vm1603_vm8 = vcmask 1041409   ;;  %s2511_s25 = sshll.u32 %s3194_s17, 1  ;;  %vm1605_vm9 = vcmask 1042434   ;;  %vm1607_vm10 = vcmask 1043459  }
  0x1d   : > { %2668 = vmatprep.subr.mxu0 %v3068_v1  ;;  %2678 = vmatpush3.msra.mxu1 %v552_v4  ;;  %v433_v7 = vld [vmem:[%s405_s26] sm:$0xff]  ;;  %s3216_s16 = scalar_lea.vmem %s3789_s3, %s3207_s27  ;;  %v948_v51 = vunpack.c.0.s8 %v947_v49  ;;  %s3318_s22 = scalar_lea.vmem %s3788_s2, %s3207_s27  ;;  %vm1609_vm12 = vcmask 1044484   ;;  %vm1611_vm13 = vcmask 1045509   ;;  %vm1613_vm14 = vcmask 1046534  }
  0x1e   : > { %2669 = vmatpush3.msra.mxu0 %v435_v5  ;;  %2830 = vmatprep.subr.mxu1 %v3068_v1  ;;  %v512_v8 = vld [vmem:[%s3216_s16] sm:$0xff]  ;;  %v513_v9 = vld [vmem:[%s3216_s16 + $0x8] sm:$0xff]  ;;  %v514_v10 = vld [vmem:[%s3216_s16 + $0x10] sm:$0xff]  ;;  %s430_s14 = scalar_lea.vmem %s3790_s4, %s2511_s25  ;;  %vm1615_vm15 = vcmask 1047559   ;;  %vm1618_vm0 = vcmask 326656   ;;  %s3591_s29 = scalar_lea.vmem %s3803_s1, %s3207_s27 }
  0x1f   : > { %2670 = vmatprep.subr.mxu0 %v3068_v1  ;;  %2679 = vmatprep.mubr.msk.f32.mxu1 %vm554_vm3, %v512_v8  ;;  %v515_v11 = vld [vmem:[%s3216_s16 + $0x18] sm:$0xff]  ;;  %v516_v12 = vld [vmem:[%s3216_s16 + $0x20] sm:$0xff]  ;;  %v517_v13 = vld [vmem:[%s3216_s16 + $0x28] sm:$0xff]  ;;  %v3304_v53 = vsub.s32 %v948_v51, %v3301_v52  ;;  %s3613_s27 = sand.u32 1, %s3058_s10   ;;  %s3797_s23 = sshll.u32 %s3145_s13, 7 }
  0x20   : > { %2671 = vmatpush3.msra.mxu0 %v434_v6  ;;  %2680 = vmatmul.mubr.msk.f32.vlgmr.msra.gmra.mxu1 %vm554_vm3, %v513_v9  ;;  %v518_v14 = vld [vmem:[%s3216_s16 + $0x30] sm:$0xff]  ;;  %v519_v15 = vld [vmem:[%s3216_s16 + $0x38] sm:$0xff]  ;;  %v520_v16 = vld [vmem:[%s3216_s16 + $0x40] sm:$0xff]  ;;  %s3796_s21 = sshll.u32 %s3613_s27, 3  ;;  %s2357_s26 = scalar_lea.hbm %s3795_s9, %s3797_s23 }
  0x21   : > { %2673 = vmatmul.mubr.msk.f32.vlgmr.msra.gmra.mxu0 %vm438_vm2, %v433_v7  ;;  %2739 = vmatprep.subr.mxu0 %v3068_v1  ;;  %v521_v17 = vld [vmem:[%s3216_s16 + $0x48] sm:$0xff]  ;;  %v522_v18 = vld [vmem:[%s3216_s16 + $0x50] sm:$0xff]  ;;  %v523_v19 = vld [vmem:[%s3216_s16 + $0x58] sm:$0xff] }
  0x22   : > { %2749 = vmatprep.mubr.msk.f32.mxu0 %vm3069_vm1, %v3068_v1  ;;  %2682 = vmatprep.mubr.msk.f32.mxu1 %vm554_vm3, %v514_v10  ;;  %v524_v20 = vld [vmem:[%s3216_s16 + $0x60] sm:$0xff]  ;;  %v525_v21 = vld [vmem:[%s3216_s16 + $0x68] sm:$0xff]  ;;  %v526_v22 = vld [vmem:[%s3216_s16 + $0x70] sm:$0xff] }
  0x23   : > { %v527_v23 = vld [vmem:[%s3216_s16 + $0x78] sm:$0xff]  ;;  %v528_v24 = vld [vmem:[%s3216_s16 + $0x80] sm:$0xff]  ;;  %v529_v25 = vld [vmem:[%s3216_s16 + $0x88] sm:$0xff] }
  0x24   : > { %2683 = vmatmul.mubr.msk.f32.gmra.mxu1 %vm554_vm3, %v515_v11  ;;  %v530_v26 = vld [vmem:[%s3216_s16 + $0x90] sm:$0xff]  ;;  %v531_v27 = vld [vmem:[%s3216_s16 + $0x98] sm:$0xff]  ;;  %v532_v28 = vld [vmem:[%s3216_s16 + $0xa0] sm:$0xff] }
  0x25   : > { %2685 = vmatprep.mubr.msk.f32.mxu1 %vm554_vm3, %v516_v12  ;;  %v533_v29 = vld [vmem:[%s3216_s16 + $0xa8] sm:$0xff]  ;;  %v534_v30 = vld [vmem:[%s3216_s16 + $0xb0] sm:$0xff]  ;;  %v535_v31 = vld [vmem:[%s3216_s16 + $0xb8] sm:$0xff] }
  0x26   : > { %v536_v32 = vld [vmem:[%s3216_s16 + $0xc0] sm:$0xff]  ;;  %v537_v33 = vld [vmem:[%s3216_s16 + $0xc8] sm:$0xff]  ;;  %v538_v34 = vld [vmem:[%s3216_s16 + $0xd0] sm:$0xff] }
  0x27   : > { %v539_v35 = vld [vmem:[%s3216_s16 + $0xd8] sm:$0xff]  ;;  %v540_v36 = vld [vmem:[%s3216_s16 + $0xe0] sm:$0xff]  ;;  %v541_v37 = vld [vmem:[%s3216_s16 + $0xe8] sm:$0xff] }
  0x28   : > { %2686 = vmatmul.mubr.msk.f32.gmra.mxu1 %vm554_vm3, %v517_v13  ;;  %v542_v38 = vld [vmem:[%s3216_s16 + $0xf0] sm:$0xff]  ;;  %v543_v39 = vld [vmem:[%s3216_s16 + $0xf8] sm:$0xff]  ;;  %v544_v40 = vld [vmem:[%s3216_s16 + $0x100] sm:$0xff] }
  0x29   : > { %2688 = vmatprep.mubr.msk.f32.mxu1 %vm554_vm3, %v518_v14  ;;  %v545_v41 = vld [vmem:[%s3216_s16 + $0x108] sm:$0xff]  ;;  %v546_v42 = vld [vmem:[%s3216_s16 + $0x110] sm:$0xff]  ;;  %v547_v43 = vld [vmem:[%s3216_s16 + $0x118] sm:$0xff] }
  0x2a   : > { %v548_v44 = vld [vmem:[%s3216_s16 + $0x120] sm:$0xff]  ;;  %v549_v45 = vld [vmem:[%s3216_s16 + $0x128] sm:$0xff]  ;;  %v550_v46 = vld [vmem:[%s3216_s16 + $0x130] sm:$0xff] }
  0x2b   : > { %v551_v47 = vld [vmem:[%s3216_s16 + $0x138] sm:$0xff]  ;;  %v1075_v63 = vld [vmem:[%s3318_s22 + $0x8] sm:$0xff]  ;;  %v1074_v2 = vld [vmem:[%s3318_s22] sm:$0xff]  ;;  %s3072_s16 = smov [#allocation4]  }
  0x2c   : > { %2689 = vmatmul.mubr.msk.f32.gmra.mxu1 %vm554_vm3, %v519_v15  ;;  %v1077_v10 = vld [vmem:[%s3318_s22 + $0x18] sm:$0xff]  ;;  %v1076_v13 = vld [vmem:[%s3318_s22 + $0x10] sm:$0xff] }
  0x2d   : > { %2691 = vmatprep.mubr.msk.f32.mxu1 %vm554_vm3, %v520_v16  ;;  %v1079_v16 = vld [vmem:[%s3318_s22 + $0x28] sm:$0xff]  ;;  %v1084_v49 = vld [vmem:[%s3318_s22 + $0x50] sm:$0xff] }
  0x30   : > { %2692 = vmatmul.mubr.msk.f32.gmra.mxu1 %vm554_vm3, %v521_v17 }
  0x31   : > { %2694 = vmatprep.mubr.msk.f32.mxu1 %vm554_vm3, %v522_v18 }
  0x34   : > { %2695 = vmatmul.mubr.msk.f32.gmra.mxu1 %vm554_vm3, %v523_v19 }
  0x35   : > { %2697 = vmatprep.mubr.msk.f32.mxu1 %vm554_vm3, %v524_v20  ;;  %v1078_v20 = vld [vmem:[%s3318_s22 + $0x20] sm:$0xff] }
  0x38   : > { %2698 = vmatmul.mubr.msk.f32.gmra.mxu1 %vm554_vm3, %v525_v21 }
  0x39   : > { %2700 = vmatprep.mubr.msk.f32.mxu1 %vm554_vm3, %v526_v22 }
  0x3c   : > { %2701 = vmatmul.mubr.msk.f32.gmra.mxu1 %vm554_vm3, %v527_v23 }
  0x3d   : > { %2703 = vmatprep.mubr.msk.f32.mxu1 %vm554_vm3, %v528_v24  ;;  %v1081_v24 = vld [vmem:[%s3318_s22 + $0x38] sm:$0xff] }
  0x40   : > { %2704 = vmatmul.mubr.msk.f32.gmra.mxu1 %vm554_vm3, %v529_v25 }
  0x41   : > { %2706 = vmatprep.mubr.msk.f32.mxu1 %vm554_vm3, %v530_v26 }
  0x44   : > { %2707 = vmatmul.mubr.msk.f32.gmra.mxu1 %vm554_vm3, %v531_v27 }
  0x45   : > { %2709 = vmatprep.mubr.msk.f32.mxu1 %vm554_vm3, %v532_v28  ;;  %v1080_v28 = vld [vmem:[%s3318_s22 + $0x30] sm:$0xff] }
  0x48   : > { %2710 = vmatmul.mubr.msk.f32.gmra.mxu1 %vm554_vm3, %v533_v29 }
  0x49   : > { %2712 = vmatprep.mubr.msk.f32.mxu1 %vm554_vm3, %v534_v30 }
  0x4c   : > { %2713 = vmatmul.mubr.msk.f32.gmra.mxu1 %vm554_vm3, %v535_v31 }
  0x4d   : > { %2715 = vmatprep.mubr.msk.f32.mxu1 %vm554_vm3, %v536_v32 }
  0x50   : > { %2716 = vmatmul.mubr.msk.f32.gmra.mxu1 %vm554_vm3, %v537_v33  ;;  %v1083_v33 = vld [vmem:[%s3318_s22 + $0x48] sm:$0xff] }
  0x51   : > { %2718 = vmatprep.mubr.msk.f32.mxu1 %vm554_vm3, %v538_v34 }
  0x54   : > { %2719 = vmatmul.mubr.msk.f32.gmra.mxu1 %vm554_vm3, %v539_v35 }
  0x55   : > { %2721 = vmatprep.mubr.msk.f32.mxu1 %vm554_vm3, %v540_v36 }
  0x58   : > { %2722 = vmatmul.mubr.msk.f32.gmra.mxu1 %vm554_vm3, %v541_v37  ;;  %v1082_v37 = vld [vmem:[%s3318_s22 + $0x40] sm:$0xff] }
  0x59   : > { %2724 = vmatprep.mubr.msk.f32.mxu1 %vm554_vm3, %v542_v38 }
  0x5c   : > { %2725 = vmatmul.mubr.msk.f32.gmra.mxu1 %vm554_vm3, %v543_v39 }
  0x5d   : > { %2727 = vmatprep.mubr.msk.f32.mxu1 %vm554_vm3, %v544_v40 }
  0x60   : > { %2728 = vmatmul.mubr.msk.f32.gmra.mxu1 %vm554_vm3, %v545_v41  ;;  %v3340_v41 = vld [vmem:[%s3793_s7] ss:$0 sm:$0xff] }
  0x61   : > { %2730 = vmatprep.mubr.msk.f32.mxu1 %vm554_vm3, %v546_v42 }
  0x64   : > { %2731 = vmatmul.mubr.msk.f32.gmra.mxu1 %vm554_vm3, %v547_v43 }
  0x65   : > { %2733 = vmatprep.mubr.msk.f32.mxu1 %vm554_vm3, %v548_v44 }
  0x68   : > { %2734 = vmatmul.mubr.msk.f32.gmra.mxu1 %vm554_vm3, %v549_v45 }
  0x69   : > { %2736 = vmatprep.mubr.msk.f32.mxu1 %vm554_vm3, %v550_v46 }
  0x6c   : > { %2737 = vmatmul.mubr.msk.f32.gmra.mxu1 %vm554_vm3, %v551_v47  ;;  %v1085_v47 = vld [vmem:[%s3318_s22 + $0x58] sm:$0xff] }
  0x6d   : > { %2840 = vmatprep.mubr.msk.f32.mxu1 %vm3069_vm1, %v3068_v1 }
  0xe0   : > { %v2681_v60 = vpop.f32.mrf.mxu1 }
  0xe1   : > { %v3306_v54 = vpop.f32.mrf.mxu0 }
  0xe2   : > { %v952_v55 = vrot.slane %v3306_v54, %v3304_v53  ;;  %v745_v0 = vpop.f32.mrf.mxu1 }
  0xe3   : > { %v2674_v57 = vpop.f32.mrf.mxu0 }
  0xe4   : > { %v960_v58 = vcombine.high %v952_v55, %v952_v55  ;;  %v968_v59 = vrot.slane %v952_v55, %v3304_v53  ;;  %v2684_v5 = vpop.f32.mrf.mxu1 }
  0xe6   : > { %v3321_v61 = vrot.slane %v960_v58, %v3304_v53  ;;  %v997_v62 = vrot.slane %v968_v59, %v3311_v56  ;;  %v755_v11 = vpop.f32.mrf.mxu1  ;;  %v990_v29 = vcombine.high %v968_v59, %v968_v59 }
  0xe8   : > { %v1035_v3 = vadd.f32 %v2681_v60, %v997_v62  ;;  %v1034_v4 = vadd.f32 %v997_v62, %v745_v0  ;;  %v1001_v6 = vrot.slane %v3321_v61, %v3311_v56  ;;  %v1037_v9 = vadd.f32 %v2684_v5, %v997_v62  ;;  %v2687_v15 = vpop.f32.mrf.mxu1 }
  0xe9   : > { %v1036_v12 = vadd.f32 %v997_v62, %v755_v11  ;;  %v1005_v38 = vrot.slane %v990_v29, %v3311_v56  ;;  %v992_v55 = vcombine.high %v3321_v61, %v3321_v61  ;;  %v945_v5 = vcombine.high %v3306_v54, %v3306_v54  ;;  %v1086_v61 = vld [vmem:[%s3318_s22 + $0x60] sm:$0xff] }
  0xea   : > { %v1115_v7 = vadd.f32 %v1075_v63, %v1035_v3  ;;  %v1114_v8 = vadd.f32 %v1074_v2, %v1034_v4  ;;  %v1117_v14 = vadd.f32 %v1077_v10, %v1037_v9  ;;  %v1039_v17 = vadd.f32 %v2687_v15, %v1001_v6  ;;  %v765_v19 = vpop.f32.mrf.mxu1  ;;  %v1087_v3 = vld [vmem:[%s3318_s22 + $0x68] sm:$0xff] }
  0xeb   : > { %v1116_v18 = vadd.f32 %v1076_v13, %v1036_v12  ;;  %v1038_v22 = vadd.f32 %v997_v62, %v765_v19 }
  0xec   : > { %2892 = vtanh.f32 %v1115_v7  ;;  %v1119_v21 = vadd.f32 %v1079_v16, %v1039_v17  ;;  %v2690_v23 = vpop.f32.mrf.mxu1  ;;  %v1089_v17 = vld [vmem:[%s3318_s22 + $0x78] sm:$0xff] }
  0xed   : > { %2894 = vtanh.f32 %v1114_v8  ;;  %v1118_v25 = vadd.f32 %v1078_v20, %v1038_v22  ;;  %v1041_v26 = vadd.f32 %v2690_v23, %v1001_v6  ;;  %v1009_v8 = vrot.slane %v992_v55, %v3311_v56 }
  0xee   : > { %2896 = vtanh.f32 %v1117_v14  ;;  %v775_v27 = vpop.f32.mrf.mxu1  ;;  %v959_v22 = vrot.slane %v945_v5, %v3304_v53 }
  0xef   : > { %2898 = vtanh.f32 %v1119_v21  ;;  %v1121_v30 = vadd.f32 %v1081_v24, %v1041_v26  ;;  %v1040_v31 = vadd.f32 %v1001_v6, %v775_v27  ;;  %v1091_v27 = vld [vmem:[%s3318_s22 + $0x88] sm:$0xff] }
  0xf0   : > { %2900 = vtanh.f32 %v1116_v18  ;;  %v2693_v32 = vpop.f32.mrf.mxu1  ;;  %v961_v55 = vcombine.high %v959_v22, %v959_v22 }
  0xf1   : > { %2902 = vtanh.f32 %v1118_v25  ;;  %v1120_v34 = vadd.f32 %v1080_v28, %v1040_v31  ;;  %v1043_v35 = vadd.f32 %v2693_v32, %v1001_v6 }
  0xf2   : > { %2904 = vtanh.f32 %v1121_v30  ;;  %v785_v36 = vpop.f32.mrf.mxu1  ;;  %v1088_v30 = vld [vmem:[%s3318_s22 + $0x70] sm:$0xff] }
  0xf3   : > { %v1123_v39 = vadd.f32 %v1083_v33, %v1043_v35  ;;  %v1042_v40 = vadd.f32 %v1001_v6, %v785_v36  ;;  %2906 = vtanh.f32 %v1120_v34  ;;  %v1090_v36 = vld [vmem:[%s3318_s22 + $0x80] sm:$0xff] }
  0xf4   : > { %v2696_v43 = vpop.f32.mrf.mxu1 }
  0xf5   : > { %2908 = vtanh.f32 %v1123_v39  ;;  %v1122_v45 = vadd.f32 %v1082_v37, %v1042_v40  ;;  %v1045_v46 = vadd.f32 %v2696_v43, %v1005_v38  ;;  %v3369_v37 = vrot.slane %v959_v22, %v3304_v53 }
  0xf6   : > { %v795_v48 = vpop.f32.mrf.mxu1 }
  0xf7   : > { %v1044_v57 = vadd.f32 %v1005_v38, %v795_v48  ;;  %2910 = vtanh.f32 %v1122_v45  ;;  %v1125_v58 = vadd.f32 %v1085_v47, %v1045_v46 }
  0xf8   : > { %v2699_v59 = vpop.f32.mrf.mxu1 }
  0xf9   : > { %v2893_v42 = vpop.eup %2892  ;;  %v1124_v0 = vadd.f32 %v1084_v49, %v1044_v57  ;;  %v1047_v2 = vadd.f32 %v2699_v59, %v1005_v38  ;;  %v1013_v59 = vrot.slane %v3369_v37, %v3311_v56 }
  0xfa   : > { %v2895_v44 = vpop.eup %2894  ;;  %v1202_v62 = vmul.f32 %v2893_v42, %v3340_v41  ;;  %v805_v6 = vpop.f32.mrf.mxu1 }
  0xfb   : > { %v1201_v51 = vmul.f32 %v2895_v44, %v3340_v41  ;;  %v2897_v63 = vpop.eup %2896  ;;  %2912 = vtanh.f32 %v1124_v0  ;;  %v1046_v9 = vadd.f32 %v1005_v38, %v805_v6  ;;  %v1127_v12 = vadd.f32 %v1087_v3, %v1047_v2  ;;  %v1093_v44 = vld [vmem:[%s3318_s22 + $0x98] sm:$0xff] }
  0xfc   : > { %v2899_v4 = vpop.eup %2898  ;;  %2914 = vtanh.f32 %v1125_v58  ;;  %v2702_v13 = vpop.f32.mrf.mxu1  ;;  %v1244_v14 = vsel %vm438_vm2, %v1202_v62, 0.0  ;;  %v1204_v15 = vmul.f32 %v2897_v63, %v3340_v41  ;;  %v1092_v58 = vld [vmem:[%s3318_s22 + $0x90] sm:$0xff] }
  0xfd   : > { %v1241_v60 = vsel %vm438_vm2, %v1201_v51, 0.0  ;;  %v2901_v7 = vpop.eup %2900  ;;  %v1206_v10 = vmul.f32 %v2899_v4, %v3340_v41  ;;  %v1126_v16 = vadd.f32 %v1086_v61, %v1046_v9  ;;  %v1049_v54 = vadd.f32 %v2702_v13, %v1009_v8 }
  0xfe   : > { %1242 = vadd.xlane.f32.xlu0 %v1241_v60  ;;  %v2903_v11 = vpop.eup %2902  ;;  %v815_v20 = vpop.f32.mrf.mxu1  ;;  %v1203_v23 = vmul.f32 %v2901_v7, %v3340_v41  ;;  %v1250_v28 = vsel %vm438_vm2, %v1204_v15, 0.0  ;;  %v1095_v7 = vld [vmem:[%s3318_s22 + $0xa8] sm:$0xff] }
  0xff   : > { %v1256_v18 = vsel %vm438_vm2, %v1206_v10, 0.0  ;;  %v2905_v19 = vpop.eup %2904  ;;  %v1205_v21 = vmul.f32 %v2903_v11, %v3340_v41  ;;  %2916 = vtanh.f32 %v1126_v16  ;;  %v1129_v24 = vadd.f32 %v1089_v17, %v1049_v54  ;;  %v1097_v16 = vld [vmem:[%s3318_s22 + $0xb8] sm:$0xff] }
 0x100   : > { %1257 = vadd.xlane.f32.xlu1 %v1256_v18  ;;  %2918 = vtanh.f32 %v1127_v12  ;;  %v1048_v25 = vadd.f32 %v1005_v38, %v815_v20  ;;  %v2705_v26 = vpop.f32.mrf.mxu1  ;;  %v2907_v29 = vpop.eup %2906  ;;  %v1208_v33 = vmul.f32 %v2905_v19, %v3340_v41  ;;  %v1247_v40 = vsel %vm438_vm2, %v1203_v23, 0.0 }
 0x101   : > { %v1051_v31 = vadd.f32 %v2705_v26, %v1009_v8  ;;  %v1253_v32 = vsel %vm438_vm2, %v1205_v21, 0.0  ;;  %2920 = vtanh.f32 %v1129_v24  ;;  %v1207_v45 = vmul.f32 %v2907_v29, %v3340_v41  ;;  %v1096_v24 = vld [vmem:[%s3318_s22 + $0xb0] sm:$0xff]  ;;  %v1099_v29 = vld [vmem:[%s3318_s22 + $0xc8] sm:$0xff] }
 0x102   : > { %1245 = vadd.xlane.f32.xlu0 %v1244_v14  ;;  %v2909_v34 = vpop.eup %2908  ;;  %v825_v35 = vpop.f32.mrf.mxu1  ;;  %v1128_v42 = vadd.f32 %v1088_v30, %v1048_v25  ;;  %v1262_v51 = vsel %vm438_vm2, %v1208_v33, 0.0  ;;  %v3386_v11 = vrot.slane %v961_v55, %v3304_v53 }
 0x103   : > { %v1131_v38 = vadd.f32 %v1091_v27, %v1051_v31  ;;  %v1050_v39 = vadd.f32 %v1009_v8, %v825_v35  ;;  %v1210_v46 = vmul.f32 %v2909_v34, %v3340_v41  ;;  %v1259_v2 = vsel %vm438_vm2, %v1207_v45, 0.0 }
 0x104   : > { %1254 = vadd.xlane.f32.xlu1 %v1253_v32  ;;  %v2708_v43 = vpop.f32.mrf.mxu1  ;;  %v2911_v47 = vpop.eup %2910  ;;  %v1017_v25 = vrot.slane %v3386_v11, %v3311_v56 }
 0x105   : > { %2922 = vtanh.f32 %v1131_v38  ;;  %v1130_v48 = vadd.f32 %v1090_v36, %v1050_v39  ;;  %v1053_v49 = vadd.f32 %v2708_v43, %v1009_v8  ;;  %v1268_v3 = vsel %vm438_vm2, %v1210_v46, 0.0  ;;  %v1098_v39 = vld [vmem:[%s3318_s22 + $0xc0] sm:$0xff]  ;;  %v1101_v46 = vld [vmem:[%s3318_s22 + $0xd8] sm:$0xff] }
 0x106   : > { %1251 = vadd.xlane.f32.xlu0 %v1250_v28  ;;  %v835_v57 = vpop.f32.mrf.mxu1  ;;  %v1209_v4 = vmul.f32 %v2911_v47, %v3340_v41 }
 0x107   : > { %2924 = vtanh.f32 %v1130_v48  ;;  %v1133_v60 = vadd.f32 %v1093_v44, %v1053_v49  ;;  %v1052_v62 = vadd.f32 %v1009_v8, %v835_v57  ;;  %v1094_v8 = vld [vmem:[%s3318_s22 + $0xa0] sm:$0xff] }
 0x108   : > { %1263 = vadd.xlane.f32.xlu1 %v1262_v51  ;;  %v2913_v63 = vpop.eup %2912  ;;  %2926 = vtanh.f32 %v1128_v42  ;;  %v2711_v0 = vpop.f32.mrf.mxu1  ;;  %v1265_v21 = vsel %vm438_vm2, %v1209_v4, 0.0  ;;  %v1103_v4 = vld [vmem:[%s3318_s22 + $0xe8] sm:$0xff] }
 0x109   : > { %v2915_v5 = vpop.eup %2914  ;;  %2928 = vtanh.f32 %v1133_v60  ;;  %v1132_v6 = vadd.f32 %v1092_v58, %v1052_v62  ;;  %v1055_v61 = vadd.f32 %v2711_v0, %v1013_v59  ;;  %v1211_v9 = vmul.f32 %v2913_v63, %v3340_v41 }
 0x10a   : > { %1248 = vadd.xlane.f32.xlu0 %v1247_v40  ;;  %v845_v10 = vpop.f32.mrf.mxu1  ;;  %v1212_v17 = vmul.f32 %v2915_v5, %v3340_v41  ;;  %v991_v63 = vcombine.high %v3369_v37, %v3369_v37 }
 0x10b   : > { %v1054_v12 = vadd.f32 %v1013_v59, %v845_v10  ;;  %2930 = vtanh.f32 %v1132_v6  ;;  %v1135_v14 = vadd.f32 %v1095_v7, %v1055_v61  ;;  %v1271_v54 = vsel %vm438_vm2, %v1211_v9, 0.0 }
 0x10c   : > { %1260 = vadd.xlane.f32.xlu1 %v1259_v2  ;;  %v2917_v13 = vpop.eup %2916  ;;  %v2714_v15 = vpop.f32.mrf.mxu1  ;;  %v1274_v35 = vsel %vm438_vm2, %v1212_v17, 0.0  ;;  %v1021_v37 = vrot.slane %v991_v63, %v3311_v56  ;;  %v1108_v63 = vld [vmem:[%s3318_s22 + $0x110] sm:$0xff] }
 0x10d   : > { %v2919_v18 = vpop.eup %2918  ;;  %v1134_v19 = vadd.f32 %v1094_v8, %v1054_v12  ;;  %v1057_v20 = vadd.f32 %v2714_v15, %v1013_v59  ;;  %v1213_v22 = vmul.f32 %v2917_v13, %v3340_v41  ;;  %v1102_v13 = vld [vmem:[%s3318_s22 + $0xe0] sm:$0xff] }
 0x10e   : > { %1269 = vadd.xlane.f32.xlu0 %v1268_v3  ;;  %v855_v23 = vpop.f32.mrf.mxu1  ;;  %v1214_v31 = vmul.f32 %v2919_v18, %v3340_v41  ;;  %v2921_v32 = vpop.eup %2920 }
 0x10f   : > { %2932 = vtanh.f32 %v1134_v19  ;;  %v1137_v26 = vadd.f32 %v1097_v16, %v1057_v20  ;;  %v1056_v27 = vadd.f32 %v1013_v59, %v855_v23  ;;  %v1277_v30 = vsel %vm438_vm2, %v1213_v22, 0.0  ;;  %v1105_v23 = vld [vmem:[%s3318_s22 + $0xf8] sm:$0xff] }
 0x110   : > { %1266 = vadd.xlane.f32.xlu1 %v1265_v21  ;;  %2934 = vtanh.f32 %v1135_v14  ;;  %v2717_v28 = vpop.f32.mrf.mxu1  ;;  %v1280_v47 = vsel %vm438_vm2, %v1214_v31, 0.0  ;;  %v1216_v48 = vmul.f32 %v2921_v32, %v3340_v41  ;;  %v1107_v32 = vld [vmem:[%s3318_s22 + $0x108] sm:$0xff] }
 0x111   : > { %2936 = vtanh.f32 %v1137_v26  ;;  %v1136_v33 = vadd.f32 %v1096_v24, %v1056_v27  ;;  %v1059_v34 = vadd.f32 %v2717_v28, %v1017_v25  ;;  %v993_v28 = vcombine.high %v3386_v11, %v3386_v11  ;;  %v1106_v11 = vld [vmem:[%s3318_s22 + $0x100] sm:$0xff] }
 0x112   : > { %1272 = vadd.xlane.f32.xlu0 %v1271_v54  ;;  %v2923_v36 = vpop.eup %2922  ;;  %v865_v38 = vpop.f32.mrf.mxu1  ;;  %v1286_v5 = vsel %vm438_vm2, %v1216_v48, 0.0  ;;  %v1109_v48 = vld [vmem:[%s3318_s22 + $0x118] sm:$0xff] }
 0x113   : > { %v1139_v40 = vadd.f32 %v1099_v29, %v1059_v34  ;;  %v1058_v42 = vadd.f32 %v1013_v59, %v865_v38  ;;  %v1218_v43 = vmul.f32 %v2923_v36, %v3340_v41  ;;  %2938 = vtanh.f32 %v1136_v33  ;;  %v1100_v59 = vld [vmem:[%s3318_s22 + $0xd0] sm:$0xff] }
 0x114   : > { %1275 = vadd.xlane.f32.xlu1 %v1274_v35  ;;  %v2925_v44 = vpop.eup %2924  ;;  %v2720_v45 = vpop.f32.mrf.mxu1 }
 0x115   : > { %v2927_v49 = vpop.eup %2926  ;;  %2940 = vtanh.f32 %v1139_v40  ;;  %v1138_v51 = vadd.f32 %v1098_v39, %v1058_v42  ;;  %v1061_v55 = vadd.f32 %v2720_v45, %v1017_v25  ;;  %v1292_v57 = vsel %vm438_vm2, %v1218_v43, 0.0 }
 0x116   : > { %1278 = vadd.xlane.f32.xlu0 %v1277_v30  ;;  %v2929_v58 = vpop.eup %2928  ;;  %v875_v60 = vpop.f32.mrf.mxu1  ;;  %v1217_v62 = vmul.f32 %v2925_v44, %v3340_v41  ;;  %v1215_v6 = vmul.f32 %v2927_v49, %v3340_v41  ;;  %v1025_v44 = vrot.slane %v993_v28, %v3311_v56 }
 0x117   : > { %v1141_v0 = vadd.f32 %v1101_v46, %v1061_v55  ;;  %v1060_v2 = vadd.f32 %v1017_v25, %v875_v60  ;;  %2942 = vtanh.f32 %v1138_v51  ;;  %v1220_v61 = vmul.f32 %v2929_v58, %v3340_v41 }
 0x118   : > { %1281 = vadd.xlane.f32.xlu1 %v1280_v47  ;;  %v2723_v3 = vpop.f32.mrf.mxu1  ;;  %v2931_v7 = vpop.eup %2930  ;;  %v1289_v8 = vsel %vm438_vm2, %v1217_v62, 0.0  ;;  %v1283_v17 = vsel %vm438_vm2, %v1215_v6, 0.0 }
 0x119   : > { %2944 = vtanh.f32 %v1141_v0  ;;  %v1140_v9 = vadd.f32 %v1100_v59, %v1060_v2  ;;  %v1063_v10 = vadd.f32 %v2723_v3, %v1017_v25  ;;  %v1298_v18 = vsel %vm438_vm2, %v1220_v61, 0.0 }
 0x11a   : > { %1293 = vadd.xlane.f32.xlu0 %v1292_v57  ;;  %v885_v12 = vpop.f32.mrf.mxu1  ;;  %v1219_v19 = vmul.f32 %v2931_v7, %v3340_v41 }
 0x11b   : > { %v1143_v14 = vadd.f32 %v1103_v4, %v1063_v10  ;;  %v1062_v15 = vadd.f32 %v1017_v25, %v885_v12  ;;  %2946 = vtanh.f32 %v1140_v9  ;;  %v1104_v25 = vld [vmem:[%s3318_s22 + $0xf0] sm:$0xff]  ;;  %v1111_v4 = vld [vmem:[%s3318_s22 + $0x128] sm:$0xff] }
 0x11c   : > { %1287 = vadd.xlane.f32.xlu1 %v1286_v5  ;;  %v2933_v16 = vpop.eup %2932  ;;  %v2726_v54 = vpop.f32.mrf.mxu1  ;;  %v1295_v33 = vsel %vm438_vm2, %v1219_v19, 0.0 }
 0x11d   : > { %v2935_v20 = vpop.eup %2934  ;;  %2948 = vtanh.f32 %v1143_v14  ;;  %v1142_v21 = vadd.f32 %v1102_v13, %v1062_v15  ;;  %v1065_v22 = vadd.f32 %v2726_v54, %v1021_v37  ;;  %v1221_v24 = vmul.f32 %v2933_v16, %v3340_v41  ;;  %v1110_v14 = vld [vmem:[%s3318_s22 + $0x120] sm:$0xff] }
 0x11e   : > { %1290 = vadd.xlane.f32.xlu0 %v1289_v8  ;;  %v2937_v26 = vpop.eup %2936  ;;  %v895_v27 = vpop.f32.mrf.mxu1  ;;  %v1222_v34 = vmul.f32 %v2935_v20, %v3340_v41 }
 0x11f   : > { %v1064_v29 = vadd.f32 %v1021_v37, %v895_v27  ;;  %2950 = vtanh.f32 %v1142_v21  ;;  %v1145_v30 = vadd.f32 %v1105_v23, %v1065_v22  ;;  %v1301_v39 = vsel %vm438_vm2, %v1221_v24, 0.0  ;;  %v1113_v23 = vld [vmem:[%s3318_s22 + $0x138] sm:$0xff] }
 0x120   : > { %1284 = vadd.xlane.f32.xlu1 %v1283_v17  ;;  %v2729_v31 = vpop.f32.mrf.mxu1  ;;  %v2939_v35 = vpop.eup %2938  ;;  %v1224_v40 = vmul.f32 %v2937_v26, %v3340_v41  ;;  %v1304_v49 = vsel %vm438_vm2, %v1222_v34, 0.0  ;;  %v1112_v26 = vld [vmem:[%s3318_s22 + $0x130] sm:$0xff]  ;;  %s3619_s22 = scalar_lea.vmem [#allocation4], %s3796_s21 }
 0x121   : > { %v1144_v36 = vadd.f32 %v1104_v25, %v1064_v29  ;;  %v1067_v38 = vadd.f32 %v2729_v31, %v1021_v37  ;;  %v1223_v51 = vmul.f32 %v2939_v35, %v3340_v41  ;;  %s2359_s28 = sshll.u32 %s3619_s22, 4  ;;  %s2360_s28 = int_to_ptr.vmem [resolvable:$true] %s2359_s28 }
 0x122   : > { %1299 = vadd.xlane.f32.xlu0 %v1298_v18  ;;  %v2941_v42 = vpop.eup %2940  ;;  %v905_v43 = vpop.f32.mrf.mxu1  ;;  %v1310_v56 = vsel %vm438_vm2, %v1224_v40, 0.0  ;;  %s2976_s17 = scalar_lea.vmem %s2360_s28, 128 }
 0x123   : > { %2952 = vtanh.f32 %v1144_v36  ;;  %v1147_v45 = vadd.f32 %v1107_v32, %v1067_v38  ;;  %v1066_v46 = vadd.f32 %v1021_v37, %v905_v43  ;;  %v1226_v55 = vmul.f32 %v2941_v42, %v3340_v41  ;;  %p2977_p12 = scmp.ne.s32.totalorder %s2360_s28, %s2976_s17 }
 0x124   : > { %1302 = vadd.xlane.f32.xlu1 %v1301_v39  ;;  %2954 = vtanh.f32 %v1145_v30  ;;  %v2732_v47 = vpop.f32.mrf.mxu1  ;;  %v2943_v57 = vpop.eup %2942  ;;  %v1307_v5 = vsel %vm438_vm2, %v1223_v51, 0.0 }
 0x125   : > { %2956 = vtanh.f32 %v1147_v45  ;;  %v1146_v58 = vadd.f32 %v1106_v11, %v1066_v46  ;;  %v1069_v60 = vadd.f32 %v2732_v47, %v1025_v44  ;;  %v1316_v6 = vsel %vm438_vm2, %v1226_v55, 0.0  ;;  %p2978_p13 = pnand %p2977_p12, %p3162_p5 }
 0x126   : > { %1296 = vadd.xlane.f32.xlu0 %v1295_v33  ;;  %v2945_v59 = vpop.eup %2944  ;;  %v915_v62 = vpop.f32.mrf.mxu1  ;;  %v1225_v61 = vmul.f32 %v2943_v57, %v3340_v41 }
 0x127   : > { %v1149_v0 = vadd.f32 %v1109_v48, %v1069_v60  ;;  %v1068_v2 = vadd.f32 %v1021_v37, %v915_v62  ;;  %2958 = vtanh.f32 %v1146_v58  ;;  %v1228_v8 = vmul.f32 %v2945_v59, %v3340_v41  ;;  %p2979_p0 = pneg %p2978_p13 }
 0x128   : > { %1311 = vadd.xlane.f32.xlu1 %v1310_v56  ;;  %v2735_v3 = vpop.f32.mrf.mxu1  ;;  %v2947_v7 = vpop.eup %2946  ;;  %v1313_v54 = vsel %vm438_vm2, %v1225_v61, 0.0 }
 0x129   : > { %2960 = vtanh.f32 %v1149_v0  ;;  %v1148_v9 = vadd.f32 %v1108_v63, %v1068_v2  ;;  %v1071_v10 = vadd.f32 %v2735_v3, %v1025_v44  ;;  %v1227_v17 = vmul.f32 %v2947_v7, %v3340_v41 }
 0x12a   : > { %1305 = vadd.xlane.f32.xlu0 %v1304_v49  ;;  %v2949_v12 = vpop.eup %2948  ;;  %v925_v13 = vpop.f32.mrf.mxu1  ;;  %v1322_v22 = vsel %vm438_vm2, %v1228_v8, 0.0 }
 0x12b   : > { %v1151_v37 = vadd.f32 %v1111_v4, %v1071_v10  ;;  %v1070_v15 = vadd.f32 %v1025_v44, %v925_v13  ;;  %2962 = vtanh.f32 %v1148_v9  ;;  %v1230_v18 = vmul.f32 %v2949_v12, %v3340_v41 }
 0x12c   : > { %1308 = vadd.xlane.f32.xlu1 %v1307_v5  ;;  %v2738_v16 = vpop.f32.mrf.mxu1  ;;  %v2951_v19 = vpop.eup %2950  ;;  %v1319_v28 = vsel %vm438_vm2, %v1227_v17, 0.0 }
 0x12d   : > { %2964 = vtanh.f32 %v1151_v37  ;;  %v1150_v20 = vadd.f32 %v1110_v14, %v1070_v15  ;;  %v1073_v21 = vadd.f32 %v2738_v16, %v1025_v44  ;;  %v1328_v29 = vsel %vm438_vm2, %v1230_v18, 0.0 }
 0x12e   : > { %1317 = vadd.xlane.f32.xlu0 %v1316_v6  ;;  %v935_v24 = vpop.f32.mrf.mxu1  ;;  %v1229_v30 = vmul.f32 %v2951_v19, %v3340_v41  ;;  %v1402_v6 = vand.u32 127, %v949_v50 }
 0x12f   : > { %v1072_v27 = vadd.f32 %v1025_v44, %v935_v24  ;;  %2966 = vtanh.f32 %v1150_v20  ;;  %v1153_v32 = vadd.f32 %v1113_v23, %v1073_v21 }
 0x130   : > { %1314 = vadd.xlane.f32.xlu1 %v1313_v54  ;;  %v2953_v25 = vpop.eup %2952  ;;  %v1325_v36 = vsel %vm438_vm2, %v1229_v30, 0.0  ;;  %v1407_v61 = vadd.s32 4294967288, %v1402_v6  ;;  %v3476_v9 = vsub.s32 %v1402_v6, %v3301_v52  ;;  %v1414_v14 = vadd.s32 4294967280, %v1402_v6 }
 0x131   : > { %v2955_v31 = vpop.eup %2954  ;;  %v1152_v33 = vadd.f32 %v1112_v26, %v1072_v27  ;;  %v1231_v34 = vmul.f32 %v2953_v25, %v3340_v41  ;;  %v1421_v37 = vadd.s32 4294967272, %v1402_v6  ;;  %v1428_v50 = vadd.s32 4294967264, %v1402_v6 }
 0x132   : > { %1323 = vadd.xlane.f32.xlu0 %v1322_v22  ;;  %v2957_v35 = vpop.eup %2956  ;;  %v1232_v42 = vmul.f32 %v2955_v31, %v3340_v41  ;;  %v3479_v10 = vsub.s32 %v1407_v61, %v3301_v52  ;;  %v3485_v17 = vsub.s32 %v1414_v14, %v3301_v52 }
 0x133   : > { %2968 = vtanh.f32 %v1152_v33  ;;  %v1331_v39 = vsel %vm438_vm2, %v1231_v34, 0.0  ;;  %v1234_v40 = vmul.f32 %v2957_v35, %v3340_v41  ;;  %v3488_v18 = vsub.s32 %v1421_v37, %v3301_v52 }
 0x134   : > { %1320 = vadd.xlane.f32.xlu1 %v1319_v28  ;;  %v2959_v38 = vpop.eup %2958  ;;  %2970 = vtanh.f32 %v1153_v32  ;;  %v1334_v45 = vsel %vm438_vm2, %v1232_v42, 0.0  ;;  %v3491_v19 = vsub.s32 %v1428_v50, %v3301_v52 }
 0x135   : > { %v1340_v44 = vsel %vm438_vm2, %v1234_v40, 0.0  ;;  %v1233_v46 = vmul.f32 %v2959_v38, %v3340_v41 }
 0x136   : > { %1329 = vadd.xlane.f32.xlu0 %v1328_v29  ;;  %v2961_v43 = vpop.eup %2960 }
 0x137   : > { %v1236_v47 = vmul.f32 %v2961_v43, %v3340_v41  ;;  %v1337_v49 = vsel %vm438_vm2, %v1233_v46, 0.0 }
 0x138   : > { %1332 = vadd.xlane.f32.xlu1 %v1331_v39  ;;  %v2963_v11 = vpop.eup %2962 }
 0x139   : > { %v1346_v51 = vsel %vm438_vm2, %v1236_v47, 0.0  ;;  %v1235_v55 = vmul.f32 %v2963_v11, %v3340_v41 }
 0x13a   : > { %1326 = vadd.xlane.f32.xlu0 %v1325_v36  ;;  %v2965_v48 = vpop.eup %2964 }
 0x13b   : > { %v1238_v57 = vmul.f32 %v2965_v48, %v3340_v41  ;;  %v1343_v56 = vsel %vm438_vm2, %v1235_v55, 0.0 }
 0x13c   : > { %1341 = vadd.xlane.f32.xlu1 %v1340_v44  ;;  %v2967_v58 = vpop.eup %2966 }
 0x13d   : > { %v1352_v59 = vsel %vm438_vm2, %v1238_v57, 0.0  ;;  %v1237_v62 = vmul.f32 %v2967_v58, %v3340_v41 }
 0x13e   : > { %1335 = vadd.xlane.f32.xlu0 %v1334_v45 }
 0x13f   : > { %v1349_v2 = vsel %vm438_vm2, %v1237_v62, 0.0 }
 0x140   : > { %1338 = vadd.xlane.f32.xlu1 %v1337_v49  ;;  %v2969_v60 = vpop.eup %2968 }
 0x141   : > { %v1239_v63 = vmul.f32 %v2969_v60, %v3340_v41  ;;  %v2971_v0 = vpop.eup %2970 }
 0x142   : > { %1347 = vadd.xlane.f32.xlu0 %v1346_v51  ;;  %v1240_v4 = vmul.f32 %v2971_v0, %v3340_v41 }
 0x143   : > { %v1355_v3 = vsel %vm438_vm2, %v1239_v63, 0.0 }
 0x144   : > { %1344 = vadd.xlane.f32.xlu1 %v1343_v56  ;;  %v1358_v5 = vsel %vm438_vm2, %v1240_v4, 0.0 }
 0x146   : > { %1353 = vadd.xlane.f32.xlu0 %v1352_v59 }
 0x148   : > { %1350 = vadd.xlane.f32.xlu1 %v1349_v2 }
 0x14a   : > { %1356 = vadd.xlane.f32.xlu0 %v1355_v3 }
 0x14c   : > { %1359 = vadd.xlane.f32.xlu1 %v1358_v5 }
 0x187   : > { %v1243_v7 = vpop.xlane.xlu0 %1242 }
 0x188   : > { %v1406_v12 = vrot.slane %v1243_v7, %v3476_v9 }
 0x189   : > { %v1258_v41 = vpop.xlane.xlu1 %1257 }
 0x18a   : > { %v1438_v29 = vrot.slane %v1258_v41, %v3476_v9 }
 0x18b   : > { %v1246_v8 = vpop.xlane.xlu0 %1245 }
 0x18c   : > { %v1411_v13 = vrot.slane %v1246_v8, %v3479_v10 }
 0x18d   : > { %v1255_v54 = vpop.xlane.xlu1 %1254 }
 0x18e   : > { %v1413_v15 = vsel %vm1412_vm4, %v1411_v13, %v1406_v12  ;;  %v1432_v24 = vrot.slane %v1255_v54, %v3491_v19  ;;  %v1620_v13 = vld [vmem:[%s430_s14] sm:$0x3]  ;;  %s2333_s14 = scalar_lea.sflag [#allocation5], %s3613_s27 }
 0x18f   : > { %v1252_v16 = vpop.xlane.xlu0 %1251  ;;  %vm1621_vm11 = vnez %v1620_v13 }
 0x190   : > { %v1425_v23 = vrot.slane %v1252_v16, %v3488_v18 }
 0x191   : > { %v1264_v21 = vpop.xlane.xlu1 %1263 }
 0x192   : > { %v1447_v33 = vrot.slane %v1264_v21, %v3485_v17 }
 0x193   : > { %v1249_v20 = vpop.xlane.xlu0 %1248 }
 0x194   : > { %v1418_v22 = vrot.slane %v1249_v20, %v3485_v17 }
 0x195   : > { %v1261_v52 = vpop.xlane.xlu1 %1260 }
 0x196   : > { %v1420_v26 = vsel %vm1419_vm5, %v1418_v22, %v1413_v15  ;;  %v1442_v30 = vrot.slane %v1261_v52, %v3479_v10 }
 0x197   : > { %v1427_v27 = vsel %vm1426_vm6, %v1425_v23, %v1420_v26  ;;  %v1270_v25 = vpop.xlane.xlu0 %1269 }
 0x198   : > { %v1434_v28 = vsel %vm1433_vm7, %v1432_v24, %v1427_v27  ;;  %v1443_v31 = vsel %vm1412_vm4, %v1442_v30, %v1438_v29  ;;  %v1457_v36 = vrot.slane %v1270_v25, %v3491_v19 }
 0x199   : > { %v1267_v34 = vpop.xlane.xlu1 %1266  ;;  %v1448_v38 = vsel %vm1419_vm5, %v1447_v33, %v1443_v31 }
 0x19a   : > { %v1452_v35 = vrot.slane %v1267_v34, %v3488_v18 }
 0x19b   : > { %v1273_v32 = vpop.xlane.xlu0 %1272 }
 0x19c   : > { %v1453_v39 = vsel %vm1426_vm6, %v1452_v35, %v1448_v38  ;;  %v1462_v61 = vrot.slane %v1273_v32, %v3476_v9 }
 0x19d   : > { %v1458_v42 = vsel %vm1433_vm7, %v1457_v36, %v1453_v39  ;;  %v1276_v43 = vpop.xlane.xlu1 %1275 }
 0x19e   : > { %v3509_v11 = vsel %vm1603_vm8, %v1458_v42, %v1434_v28  ;;  %v1466_v4 = vrot.slane %v1276_v43, %v3479_v10 }
 0x19f   : > { %v1279_v40 = vpop.xlane.xlu0 %1278 }
 0x1a0   : > { %v1467_v12 = vsel %vm1412_vm4, %v1466_v4, %v1462_v61  ;;  %v1471_v41 = vrot.slane %v1279_v40, %v3485_v17 }
 0x1a1   : > { %v1282_v44 = vpop.xlane.xlu1 %1281 }
 0x1a2   : > { %v1476_v14 = vrot.slane %v1282_v44, %v3488_v18  ;;  %v1472_v24 = vsel %vm1419_vm5, %v1471_v41, %v1467_v12 }
 0x1a3   : > { %v1294_v45 = vpop.xlane.xlu0 %1293 }
 0x1a4   : > { %v1495_v16 = vrot.slane %v1294_v45, %v3485_v17  ;;  %v1477_v28 = vsel %vm1426_vm6, %v1476_v14, %v1472_v24  ;;  %v3071_v45 = vmov 0   ;;  %v1688_v24 = vld [vmem:[%s3591_s29 + $0x10] sm:$0xff] }
 0x1a5   : > { %v1288_v46 = vpop.xlane.xlu1 %1287 }
 0x1a6   : > { %v1486_v5 = vrot.slane %v1288_v46, %v3476_v9  ;;  %v1622_v46 = vsel %vm1621_vm11, 16843009, %v3071_v45  ;;  %v1692_v45 = vld [vmem:[%s3591_s29 + $0x30] sm:$0xff] }
 0x1a7   : > { %v1291_v47 = vpop.xlane.xlu0 %1290 }
 0x1a8   : > { %v1490_v6 = vrot.slane %v1291_v47, %v3479_v10 }
 0x1a9   : > { %v1285_v48 = vpop.xlane.xlu1 %1284 }
 0x1aa   : > { %v1491_v37 = vsel %vm1412_vm4, %v1490_v6, %v1486_v5  ;;  %v1481_v26 = vrot.slane %v1285_v48, %v3491_v19  ;;  %v1623_v5 = vunpack.c.0.s8 %v1622_v46 }
 0x1ab   : > { %v1300_v49 = vpop.xlane.xlu0 %1299  ;;  %v1496_v27 = vsel %vm1419_vm5, %v1495_v16, %v1491_v37 }
 0x1ac   : > { %v1505_v38 = vrot.slane %v1300_v49, %v3491_v19  ;;  %v1482_v43 = vsel %vm1433_vm7, %v1481_v26, %v1477_v28  ;;  %vm1624_vm2 = vcmp.ne.s32.totalorder %v1623_v5, 0  ;;  %v1687_v26 = vld [vmem:[%s3591_s29 + $0x8] sm:$0xff]  ;;  %v1686_v28 = vld [vmem:[%s3591_s29] sm:$0xff]  ;;  %v1709_v5 = vld [vmem:[%s3591_s29 + $0xb8] sm:$0xff] }
 0x1ad   : > { %v1303_v51 = vpop.xlane.xlu1 %1302  ;;  %v1606_v6 = vsel %vm1605_vm9, %v1482_v43, %v3509_v11  ;;  %v1693_v43 = vld [vmem:[%s3591_s29 + $0x38] sm:$0xff] }
 0x1ae   : > { %v1510_v23 = vrot.slane %v1303_v51, %v3476_v9 }
 0x1af   : > { %v1297_v55 = vpop.xlane.xlu0 %1296 }
 0x1b0   : > { %v1500_v15 = vrot.slane %v1297_v55, %v3488_v18 }
 0x1b1   : > { %v1312_v57 = vpop.xlane.xlu1 %1311 }
 0x1b2   : > { %v1501_v52 = vsel %vm1426_vm6, %v1500_v15, %v1496_v27  ;;  %v1524_v39 = vrot.slane %v1312_v57, %v3488_v18  ;;  %v1725_v27 = vld [vmem:[%s3591_s29 + $0x138] sm:$0xff] }
 0x1b3   : > { %v1306_v58 = vpop.xlane.xlu0 %1305  ;;  %v1506_v47 = vsel %vm1433_vm7, %v1505_v38, %v1501_v52  ;;  %2831 = vmatpush3.msra.mxu1 %v1725_v27  ;;  %v1723_v52 = vld [vmem:[%s3591_s29 + $0x128] sm:$0xff] }
 0x1b4   : > { %v1514_v50 = vrot.slane %v1306_v58, %v3479_v10  ;;  %2832 = vmatprep.subr.mxu1 %v3068_v1 }
 0x1b5   : > { %v1309_v60 = vpop.xlane.xlu1 %1308 }
 0x1b6   : > { %v1519_v54 = vrot.slane %v1309_v60, %v3485_v17  ;;  %v1515_v29 = vsel %vm1412_vm4, %v1514_v50, %v1510_v23  ;;  %v1689_v23 = vld [vmem:[%s3591_s29 + $0x18] sm:$0xff] }
 0x1b7   : > { %v1318_v56 = vpop.xlane.xlu0 %1317 }
 0x1b8   : > { %v1534_v25 = vrot.slane %v1318_v56, %v3476_v9  ;;  %v1520_v31 = vsel %vm1419_vm5, %v1519_v54, %v1515_v29  ;;  %v1722_v29 = vld [vmem:[%s3591_s29 + $0x120] sm:$0xff] }
 0x1b9   : > { %v3511_v59 = vpop.xlane.xlu1 %1314  ;;  %v1525_v48 = vsel %vm1426_vm6, %v1524_v39, %v1520_v31  ;;  %v1695_v39 = vld [vmem:[%s3591_s29 + $0x48] sm:$0xff] }
 0x1ba   : > { %v1529_v44 = vrot.slane %v3511_v59, %v3491_v19 }
 0x1bb   : > { %v1324_v62 = vpop.xlane.xlu0 %1323 }
 0x1bc   : > { %v1543_v40 = vrot.slane %v1324_v62, %v3485_v17  ;;  %v1530_v4 = vsel %vm1433_vm7, %v1529_v44, %v1525_v48  ;;  %v1691_v48 = vld [vmem:[%s3591_s29 + $0x28] sm:$0xff] }
 0x1bd   : > { %v1321_v63 = vpop.xlane.xlu1 %1320 }
 0x1be   : > { %v1538_v20 = vrot.slane %v1321_v63, %v3479_v10 }
 0x1bf   : > { %v3513_v0 = vpop.xlane.xlu0 %1329 }
 0x1c0   : > { %v1539_v32 = vsel %vm1412_vm4, %v1538_v20, %v1534_v25  ;;  %v1553_v55 = vrot.slane %v3513_v0, %v3491_v19  ;;  %v1724_v25 = vld [vmem:[%s3591_s29 + $0x130] sm:$0xff] }
 0x1c1   : > { %v1333_v2 = vpop.xlane.xlu1 %1332  ;;  %v1544_v49 = vsel %vm1419_vm5, %v1543_v40, %v1539_v32  ;;  %2833 = vmatpush3.msra.mxu1 %v1724_v25  ;;  %v1694_v40 = vld [vmem:[%s3591_s29 + $0x40] sm:$0xff] }
 0x1c2   : > { %v1558_v42 = vrot.slane %v1333_v2, %v3476_v9  ;;  %2834 = vmatprep.subr.mxu1 %v3068_v1 }
 0x1c3   : > { %v1327_v3 = vpop.xlane.xlu0 %1326  ;;  %2835 = vmatpush3.msra.mxu1 %v1723_v52 }
 0x1c4   : > { %v1548_v33 = vrot.slane %v1327_v3, %v3488_v18  ;;  %2836 = vmatprep.subr.mxu1 %v3068_v1 }
 0x1c5   : > { %v3523_v7 = vpop.xlane.xlu1 %1341  ;;  %2837 = vmatpush3.msra.mxu1 %v1722_v29 }
 0x1c6   : > { %v1549_v57 = vsel %vm1426_vm6, %v1548_v33, %v1544_v49  ;;  %v1572_v62 = vrot.slane %v3523_v7, %v3488_v18  ;;  %2838 = vmatprep.subr.mxu1 %v3068_v1 }
 0x1c7   : > { %v1336_v8 = vpop.xlane.xlu0 %1335  ;;  %v1554_v61 = vsel %vm1433_vm7, %v1553_v55, %v1549_v57  ;;  %v1699_v55 = vld [vmem:[%s3591_s29 + $0x68] sm:$0xff]  ;;  %v1698_v57 = vld [vmem:[%s3591_s29 + $0x60] sm:$0xff] }
 0x1c8   : > { %v1562_v30 = vrot.slane %v1336_v8, %v3479_v10 }
 0x1c9   : > { %v1339_v21 = vpop.xlane.xlu1 %1338 }
 0x1ca   : > { %v1567_v34 = vrot.slane %v1339_v21, %v3485_v17  ;;  %v1563_v51 = vsel %vm1412_vm4, %v1562_v30, %v1558_v42  ;;  %v1721_v30 = vld [vmem:[%s3591_s29 + $0x118] sm:$0xff] }
 0x1cb   : > { %v1348_v22 = vpop.xlane.xlu0 %1347  ;;  %2839 = vmatpush3.msra.mxu1 %v1721_v30 }
 0x1cc   : > { %v1568_v58 = vsel %vm1419_vm5, %v1567_v34, %v1563_v51  ;;  %v1582_v63 = vrot.slane %v1348_v22, %v3476_v9  ;;  %v1608_v9 = vsel %vm1607_vm10, %v1506_v47, %v1606_v6  ;;  %v1690_v22 = vld [vmem:[%s3591_s29 + $0x20] sm:$0xff]  ;;  %v1700_v51 = vld [vmem:[%s3591_s29 + $0x70] sm:$0xff] }
 0x1cd   : > { %v1345_v35 = vpop.xlane.xlu1 %1344  ;;  %v1573_v8 = vsel %vm1426_vm6, %v1572_v62, %v1568_v58  ;;  %2740 = vmatpush3.msra.mxu0 %v1690_v22  ;;  %v1697_v58 = vld [vmem:[%s3591_s29 + $0x58] sm:$0xff]  ;;  %v1704_v62 = vld [vmem:[%s3591_s29 + $0x90] sm:$0xff] }
 0x1ce   : > { %v1577_v60 = vrot.slane %v1345_v35, %v3491_v19  ;;  %2741 = vmatprep.subr.mxu0 %v3068_v1  ;;  %v1708_v6 = vld [vmem:[%s3591_s29 + $0xb0] sm:$0xff] }
 0x1cf   : > { %v1354_v36 = vpop.xlane.xlu0 %1353  ;;  %2742 = vmatpush3.msra.mxu0 %v1689_v23 }
 0x1d0   : > { %v1591_v0 = vrot.slane %v1354_v36, %v3485_v17  ;;  %v1610_v17 = vsel %vm1609_vm12, %v1530_v4, %v1608_v9  ;;  %2743 = vmatprep.subr.mxu0 %v3068_v1  ;;  %v1715_v9 = vld [vmem:[%s3591_s29 + $0xe8] sm:$0xff] }
 0x1d1   : > { %v1351_v56 = vpop.xlane.xlu1 %1350  ;;  %v1612_v13 = vsel %vm1611_vm13, %v1554_v61, %v1610_v17  ;;  %2744 = vmatpush3.msra.mxu0 %v1688_v24  ;;  %v1707_v61 = vld [vmem:[%s3591_s29 + $0xa8] sm:$0xff]  ;;  %v1720_v17 = vld [vmem:[%s3591_s29 + $0x110] sm:$0xff] }
 0x1d2   : > { %v1586_v2 = vrot.slane %v1351_v56, %v3479_v10  ;;  %v1578_v10 = vsel %vm1433_vm7, %v1577_v60, %v1573_v8  ;;  %2745 = vmatprep.subr.mxu0 %v3068_v1  ;;  %v1696_v60 = vld [vmem:[%s3591_s29 + $0x50] sm:$0xff]  ;;  %v1706_v8 = vld [vmem:[%s3591_s29 + $0xa0] sm:$0xff] }
 0x1d3   : > { %v1357_v59 = vpop.xlane.xlu0 %1356  ;;  %v1614_v37 = vsel %vm1613_vm14, %v1578_v10, %v1612_v13  ;;  %2746 = vmatpush3.msra.mxu0 %v1687_v26  ;;  %v1714_v10 = vld [vmem:[%s3591_s29 + $0xe0] sm:$0xff]  ;;  %v1717_v13 = vld [vmem:[%s3591_s29 + $0xf8] sm:$0xff] }
 0x1d4   : > { %v1596_v3 = vrot.slane %v1357_v59, %v3488_v18  ;;  %v1587_v7 = vsel %vm1412_vm4, %v1586_v2, %v1582_v63  ;;  %2747 = vmatprep.subr.mxu0 %v3068_v1  ;;  %v1705_v59 = vld [vmem:[%s3591_s29 + $0x98] sm:$0xff]  ;;  %v1703_v63 = vld [vmem:[%s3591_s29 + $0x88] sm:$0xff]  ;;  %v1702_v2 = vld [vmem:[%s3591_s29 + $0x80] sm:$0xff] }
 0x1d5   : > { %v1592_v18 = vsel %vm1419_vm5, %v1591_v0, %v1587_v7  ;;  %v1360_v12 = vpop.xlane.xlu1 %1359  ;;  %2748 = vmatpush3.msra.mxu0 %v1686_v28  ;;  %v1710_v0 = vld [vmem:[%s3591_s29 + $0xc0] sm:$0xff] }
 0x1d6   : > { %v1597_v41 = vsel %vm1426_vm6, %v1596_v3, %v1592_v18  ;;  %v1601_v11 = vrot.slane %v1360_v12, %v3491_v19  ;;  %2752 = vmatprep.subr.mxu0 %v3068_v1  ;;  %v1701_v3 = vld [vmem:[%s3591_s29 + $0x78] sm:$0xff]  ;;  %v1711_v12 = vld [vmem:[%s3591_s29 + $0xc8] sm:$0xff] }
 0x1d7   : > { %v1713_v18 = vld [vmem:[%s3591_s29 + $0xd8] sm:$0xff] }
 0x1d8   : > { %v1602_v14 = vsel %vm1433_vm7, %v1601_v11, %v1597_v41  ;;  %v1719_v41 = vld [vmem:[%s3591_s29 + $0x108] sm:$0xff]  ;;  %v1718_v11 = vld [vmem:[%s3591_s29 + $0x100] sm:$0xff] }
 0x1d9   : > { %v1616_v15 = vsel %vm1615_vm15, %v1602_v14, %v1614_v37  ;;  %v1716_v14 = vld [vmem:[%s3591_s29 + $0xf0] sm:$0xff] }
 0x1da   : > { %v1619_v50 = vsel %vm1618_vm0, %v1616_v15, 0.0 }
 0x1db   : > { %v1625_v16 = vsel %vm1624_vm2, -inf, %v1619_v50 }
 0x1dc   : > { %1626 = vmax.xlane.f32.xlu0 %v1625_v16 }
 0x265   : > { %v1627_v54 = vpop.xlane.xlu0 %1626 }
 0x266   : > { %v1628_v20 = vsub.f32 %v1625_v16, %v1627_v54 }
 0x268   : > { %v1629_v21 = vmul.f32 1.442695, %v1628_v20 }
 0x26a   : > { %2972 = vpow2.f32 %v1629_v21 }
 0x277   : > { %v2973_v19 = vpop.eup %2972 }
 0x278   : > { %1631 = vadd.xlane.f32.xlu1 %v2973_v19 }
 0x301   : > { %v1632_v31 = vpop.xlane.xlu1 %1631 }
 0x302   : > { %2974 = vrcp.f32 %v1632_v31 }
 0x30f   : > { %v2975_v32 = vpop.eup %2974 }
 0x310   : > { %v1634_v33 = vmul.f32 %v2975_v32, %v2973_v19 }
 0x312   : > { %v1637_v34 = vcombine.high %v1634_v33, %v1634_v33  ;;  %v1644_v35 = vrot.slane %v1634_v33, %v3304_v53  ;;  %1635 = vst [vmem:[%s3619_s22] sm:$0xff] %v1634_v33 }
 0x314   : > { %v3623_v36 = vrot.slane %v1637_v34, %v3304_v53  ;;  %v1660_v38 = vrot.slane %v1644_v35, %v3304_v53  ;;  %v1652_v47 = vcombine.high %v1644_v35, %v1644_v35 }
 0x316   : > { %2750 = vmatmul.mubr.msk.f32.vlgmr.msra.gmra.mxu0 %vm1618_vm0, %v1660_v38  ;;  %v1653_v42 = vcombine.high %v3623_v36, %v3623_v36  ;;  %v1674_v49 = vrot.slane %v1652_v47, %v3304_v53  ;;  %v1682_v56 = vcombine.high %v1660_v38, %v1660_v38  ;;  %v1667_v7 = vrot.slane %v3623_v36, %v3304_v53 }
 0x317   : > { %2753 = vmatpush3.msra.mxu0 %v1695_v39  ;;  %2762 = vmatprep.mubr.msk.f32.mxu0 %vm3069_vm1, %v3068_v1 }
 0x318   : > { %2754 = vmatprep.subr.mxu0 %v3068_v1  ;;  %v3636_v44 = vrot.slane %v1653_v42, %v3304_v53  ;;  %v1684_v4 = vcombine.high %v1674_v49, %v1674_v49  ;;  %v1712_v53 = vld [vmem:[%s3591_s29 + $0xd0] sm:$0xff]  ;;  %v1683_v37 = vcombine.high %v1667_v7, %v1667_v7  ;;  %s2980_s29 = sshll.u32 %s3072_s16, 4  ;;  %s2981_s29 = int_to_ptr.vmem [resolvable:$false] %s2980_s29 }
 0x319   : > { %2755 = vmatpush3.msra.mxu0 %v1694_v40  ;;  %s2982_s21 = scalar_lea.vmem %s2981_s29, 256  ;;  %p2983_p1 = scmp.lt.s32.totalorder %s2360_s28, %s2981_s29 }
 0x31a   : > { %2756 = vmatprep.subr.mxu0 %v3068_v1  ;;  %v1685_v46 = vcombine.high %v3636_v44, %v3636_v44  ;;  %p2984_p2 = scmp.lt.s32.totalorder %s2982_s21, %s2976_s17 }
 0x31b   : > { %2757 = vmatpush3.msra.mxu0 %v1693_v43 }
 0x31c   : > { %2758 = vmatprep.subr.mxu0 %v3068_v1  ;;  %2841 = vmatmul.mubr.msk.f32.vlgmr.msra.gmra.mxu1 %vm1618_vm0, %v1685_v46  ;;  %p2985_p3 = por %p2984_p2, %p2983_p1 }
 0x31d   : > { %2759 = vmatpush3.msra.mxu0 %v1692_v45 }
 0x31e   : > { %2760 = vmatprep.subr.mxu0 %v3068_v1  ;;  %p2986_p4 = pnand %p2985_p3, %p2979_p0 }
 0x31f   : > { %2761 = vmatpush3.msra.mxu0 %v1691_v48 }
 0x320   : > { %2763 = vmatmul.mubr.msk.f32.vlgmr.msra.gmra.mxu0 %vm1618_vm0, %v1674_v49  ;;  %2765 = vmatprep.subr.mxu0 %v3068_v1 }
 0x321   : > { %2766 = vmatpush3.msra.mxu0 %v1700_v51  ;;  %2775 = vmatprep.mubr.msk.f32.mxu0 %vm3069_vm1, %v3068_v1 }
 0x322   : > { %2767 = vmatprep.subr.mxu0 %v3068_v1 }
 0x323   : > { %2768 = vmatpush3.msra.mxu0 %v1699_v55 }
 0x324   : > { %2769 = vmatprep.subr.mxu0 %v3068_v1 }
 0x325   : > { %2770 = vmatpush3.msra.mxu0 %v1698_v57 }
 0x326   : > { %2771 = vmatprep.subr.mxu0 %v3068_v1 }
 0x327   : > { %2772 = vmatpush3.msra.mxu0 %v1697_v58 }
 0x328   : > { %2773 = vmatprep.subr.mxu0 %v3068_v1 }
 0x329   : > { %2774 = vmatpush3.msra.mxu0 %v1696_v60 }
 0x32a   : > { %2776 = vmatmul.mubr.msk.f32.vlgmr.msra.gmra.mxu0 %vm1618_vm0, %v1682_v56  ;;  %2778 = vmatprep.subr.mxu0 %v3068_v1 }
 0x32b   : > { %2779 = vmatpush3.msra.mxu0 %v1705_v59  ;;  %2788 = vmatprep.mubr.msk.f32.mxu0 %vm3069_vm1, %v3068_v1 }
 0x32c   : > { %2780 = vmatprep.subr.mxu0 %v3068_v1 }
 0x32d   : > { %2781 = vmatpush3.msra.mxu0 %v1704_v62 }
 0x32e   : > { %2782 = vmatprep.subr.mxu0 %v3068_v1 }
 0x32f   : > { %2783 = vmatpush3.msra.mxu0 %v1703_v63 }
 0x330   : > { %2784 = vmatprep.subr.mxu0 %v3068_v1 }
 0x331   : > { %2785 = vmatpush3.msra.mxu0 %v1702_v2 }
 0x332   : > { %2786 = vmatprep.subr.mxu0 %v3068_v1 }
 0x333   : > { %2787 = vmatpush3.msra.mxu0 %v1701_v3 }
 0x334   : > { %2789 = vmatmul.mubr.msk.f32.vlgmr.msra.gmra.mxu0 %vm1618_vm0, %v1684_v4  ;;  %2791 = vmatprep.subr.mxu0 %v3068_v1 }
 0x335   : > { %2792 = vmatpush3.msra.mxu0 %v1710_v0  ;;  %2801 = vmatprep.mubr.msk.f32.mxu0 %vm3069_vm1, %v3068_v1 }
 0x336   : > { %2793 = vmatprep.subr.mxu0 %v3068_v1 }
 0x337   : > { %2794 = vmatpush3.msra.mxu0 %v1709_v5 }
 0x338   : > { %2795 = vmatprep.subr.mxu0 %v3068_v1 }
 0x339   : > { %2796 = vmatpush3.msra.mxu0 %v1708_v6 }
 0x33a   : > { %2797 = vmatprep.subr.mxu0 %v3068_v1 }
 0x33b   : > { %2798 = vmatpush3.msra.mxu0 %v1707_v61 }
 0x33c   : > { %2799 = vmatprep.subr.mxu0 %v3068_v1 }
 0x33d   : > { %2800 = vmatpush3.msra.mxu0 %v1706_v8 }
 0x33e   : > { %2802 = vmatmul.mubr.msk.f32.vlgmr.msra.gmra.mxu0 %vm1618_vm0, %v1667_v7  ;;  %2804 = vmatprep.subr.mxu0 %v3068_v1 }
 0x33f   : > { %2805 = vmatpush3.msra.mxu0 %v1715_v9  ;;  %2814 = vmatprep.mubr.msk.f32.mxu0 %vm3069_vm1, %v3068_v1 }
 0x340   : > { %2806 = vmatprep.subr.mxu0 %v3068_v1 }
 0x341   : > { %2807 = vmatpush3.msra.mxu0 %v1714_v10 }
 0x342   : > { %2808 = vmatprep.subr.mxu0 %v3068_v1 }
 0x343   : > { %2809 = vmatpush3.msra.mxu0 %v1713_v18 }
 0x344   : > { %2810 = vmatprep.subr.mxu0 %v3068_v1 }
 0x345   : > { %2811 = vmatpush3.msra.mxu0 %v1712_v53 }
 0x346   : > { %2812 = vmatprep.subr.mxu0 %v3068_v1 }
 0x347   : > { %2813 = vmatpush3.msra.mxu0 %v1711_v12 }
 0x348   : > { %2815 = vmatmul.mubr.msk.f32.vlgmr.msra.gmra.mxu0 %vm1618_vm0, %v3636_v44  ;;  %2817 = vmatprep.subr.mxu0 %v3068_v1 }
 0x349   : > { %2818 = vmatpush3.msra.mxu0 %v1720_v17  ;;  %2827 = vmatprep.mubr.msk.f32.mxu0 %vm3069_vm1, %v3068_v1 }
 0x34a   : > { %2819 = vmatprep.subr.mxu0 %v3068_v1 }
 0x34b   : > { %2820 = vmatpush3.msra.mxu0 %v1719_v41 }
 0x34c   : > { %2821 = vmatprep.subr.mxu0 %v3068_v1 }
 0x34d   : > { %2822 = vmatpush3.msra.mxu0 %v1718_v11 }
 0x34e   : > { %2823 = vmatprep.subr.mxu0 %v3068_v1 }
 0x34f   : > { %2824 = vmatpush3.msra.mxu0 %v1717_v13 }
 0x350   : > { %2825 = vmatprep.subr.mxu0 %v3068_v1 }
 0x351   : > { %2826 = vmatpush3.msra.mxu0 %v1716_v14 }
 0x352   : > { %2828 = vmatmul.mubr.msk.f32.vlgmr.msra.gmra.mxu0 %vm1618_vm0, %v1683_v37 }
 0x353   : > { %2989 = shalt.err (!%p2986_p4)
}
 0x354   : > { %s2990_s0 = scalar_lea.hbm %s2357_s26, 128  ;;  %s2994_s25 = scalar_lea.hbm %s3795_s9, 256 }
 0x355   : > { %p2991_p7 = scmp.ne.s32.totalorder %s2357_s26, %s2990_s0  ;;  %p2995_p10 = scmp.lt.s32.totalorder %s2357_s26, %s3795_s9 }
 0x356   : > { %p2996_p11 = scmp.lt.s32.totalorder %s2994_s25, %s2990_s0 }
 0x357   : > { %p2992_p8 = pnand %p2991_p7, %p3162_p5 }
 0x358   : > { %p2997_p12 = por %p2996_p11, %p2995_p10 }
 0x359   : > { %p2993_p9 = pneg %p2992_p8 }
 0x35b   : > { %p2998_p13 = pnand %p2997_p12, %p2993_p9 }
 0x35d   : > { %3001 = shalt.err (!%p2998_p13)
}
 0x35e   : > { %2845 = dma.vmem_to_hbm [thread:$0]  (%p3162_p5), %s2360_s28, 128, %s2357_s26, %s2333_s14   ;;  %vm2325_vm1 = vcmask 523264  }
 0x35f   : > { %s3804_s0 = sshll.u32 %s3613_s27, 3  ;;  %s3805_s23 = sshll.u32 %s3145_s13, 7 }
 0x360   : > { %s394_s1 = scalar_lea.vmem [#allocation2], %s3804_s0  ;;  %s3749_s14 = scalar_lea.hbm %s3794_s8, %s3805_s23 }
 0x361   : > { %s2346_s21 = sshll.u32 %s394_s1, 4  ;;  %s2328_s17 = scalar_lea.sflag [#allocation3], %s3613_s27  ;;  %s2347_s21 = int_to_ptr.vmem [resolvable:$true] %s2346_s21 }
 0x362   : > { %s3002_s16 = scalar_lea.vmem %s2347_s21, 128  ;;  %s3073_s29 = smov [#allocation2]  }
 0x363   : > { %p3003_p0 = scmp.ne.s32.totalorder %s2347_s21, %s3002_s16  ;;  %s3006_s22 = sshll.u32 %s3073_s29, 4  ;;  %s3007_s22 = int_to_ptr.vmem [resolvable:$false] %s3006_s22 }
 0x364   : > { %s3008_s24 = scalar_lea.vmem %s3007_s22, 256  ;;  %p3009_p3 = scmp.lt.s32.totalorder %s2347_s21, %s3007_s22 }
 0x365   : > { %p3004_p1 = pnand %p3003_p0, %p3162_p5  ;;  %p3010_p4 = scmp.lt.s32.totalorder %s3008_s24, %s3002_s16 }
 0x367   : > { %p3005_p2 = pneg %p3004_p1  ;;  %p3011_p7 = por %p3010_p4, %p3009_p3 }
 0x369   : > { %p3012_p8 = pnand %p3011_p7, %p3005_p2 }
 0x3d6   : > { %v1794_v1 = vpop.f32.mrf.mxu0 }
 0x3d8   : > { %v2751_v15 = vpop.f32.mrf.mxu0 }
 0x3dc   : > { %v2298_v50 = vpop.f32.mrf.mxu1 }
 0x3dd   : > { %v2322_v39 = vrot.slane %v2298_v50, 1 }
 0x3de   : > { %v2842_v16 = vpop.f32.mrf.mxu1 }
 0x3e0   : > { %v1866_v54 = vpop.f32.mrf.mxu0 }
 0x3e1   : > { %v2310_v28 = vrot.slane %v1866_v54, 7 }
 0x3e2   : > { %v2764_v20 = vpop.f32.mrf.mxu0 }
 0x3e3   : > { %v2311_v31 = vsel %vm1603_vm8, %v2310_v28, %v1794_v1 }
 0x3ea   : > { %v1938_v21 = vpop.f32.mrf.mxu0 }
 0x3eb   : > { %v2312_v52 = vrot.slane %v1938_v21, 6 }
 0x3ec   : > { %v2777_v19 = vpop.f32.mrf.mxu0 }
 0x3ed   : > { %v2313_v33 = vsel %vm1605_vm9, %v2312_v52, %v2311_v31 }
 0x3f4   : > { %v2010_v22 = vpop.f32.mrf.mxu0 }
 0x3f5   : > { %v2314_v29 = vrot.slane %v2010_v22, 5 }
 0x3f6   : > { %v2790_v23 = vpop.f32.mrf.mxu0 }
 0x3f7   : > { %v2315_v34 = vsel %vm1607_vm10, %v2314_v29, %v2313_v33 }
 0x3fe   : > { %v2082_v24 = vpop.f32.mrf.mxu0 }
 0x3ff   : > { %v2316_v30 = vrot.slane %v2082_v24, 4 }
 0x400   : > { %v2803_v26 = vpop.f32.mrf.mxu0 }
 0x401   : > { %v2317_v36 = vsel %vm1609_vm12, %v2316_v30, %v2315_v34 }
 0x408   : > { %v2154_v27 = vpop.f32.mrf.mxu0 }
 0x409   : > { %v2318_v32 = vrot.slane %v2154_v27, 3 }
 0x40a   : > { %v2816_v25 = vpop.f32.mrf.mxu0 }
 0x40b   : > { %v2319_v40 = vsel %vm1611_vm13, %v2318_v32, %v2317_v36 }
 0x412   : > { %v2226_v35 = vpop.f32.mrf.mxu0 }
 0x413   : > { %v2320_v38 = vrot.slane %v2226_v35, 2 }
 0x414   : > { %v2829_v42 = vpop.f32.mrf.mxu0 }
 0x415   : > { %v2321_v43 = vsel %vm1613_vm14, %v2320_v38, %v2319_v40 }
 0x416   : > { %v2323_v44 = vsel %vm1615_vm15, %v2322_v39, %v2321_v43 }
 0x417   : > { %2326 = vst.msk [vmem:[%s394_s1] sm:$0xff] %vm2325_vm1, %v2323_v44 }
 0x418   : > { %3015 = shalt.err (!%p3012_p8)
}
 0x419   : > { %s3016_s13 = scalar_lea.hbm %s3749_s14, 128  ;;  %s3020_s0 = scalar_lea.hbm %s3794_s8, 256 }
 0x41a   : > { %p3017_p9 = scmp.ne.s32.totalorder %s3749_s14, %s3016_s13  ;;  %p3021_p12 = scmp.lt.s32.totalorder %s3749_s14, %s3794_s8 }
 0x41b   : > { %p3022_p13 = scmp.lt.s32.totalorder %s3020_s0, %s3016_s13 }
 0x41c   : > { %p3018_p10 = pnand %p3017_p9, %p3162_p5 }
 0x41d   : > { %p3023_p0 = por %p3022_p13, %p3021_p12 }
 0x41e   : > { %p3019_p11 = pneg %p3018_p10 }
 0x420   : > { %p3024_p1 = pnand %p3023_p0, %p3019_p11 }
 0x422   : > { %3027 = shalt.err (!%p3024_p1)
}
 0x423   : > { %2844 = dma.vmem_to_hbm [thread:$0]  (%p3162_p5), %s2347_s21, 128, %s3749_s14, %s2328_s17  }
 0x424 PF: > { %p2855_p2 = scmp.ge.s32.totalorder %s3066_s12, 2  ;;  %s2371_s26 = sand.u32 1, %s3054_s30  }
 0x425   : > { %s2372_s28 = scalar_lea.sflag [#allocation3], %s2371_s26 }
 0x426   : > { %p2849_p3 = pnand %p2855_p2, %p3166_p6 }
 0x428   : > { %p2850_p4 = pneg %p2849_p3 }
 0x42a   : > { %3045 = dma.done.wait (%p2850_p4), %s2372_s28, 128  }
 0x42b   : > { %3047 = vsyncadd (%p2850_p4), %s2372_s28, 4294967168  ;;  %s2381_s16 = scalar_lea.sflag [#allocation5], %s2371_s26 }
 0x42c   : > { %3049 = dma.done.wait (%p2850_p4), %s2381_s16, 128  }
 0x42d   : > { %3051 = vsyncadd (%p2850_p4), %s2381_s16, 4294967168  ;;  %p23_p5 = scmp.ge.s32.totalorder %s3149_s15, 4   ;;  %s3806_s30 = smov %s3058_s10 }
 0x42e   : > { %s3807_s10 = smov %s3062_s11  ;;  %s3808_s11 = smov %s3160_s18 }
 0x42f   : > { %s3809_s12 = smov %s3149_s15  ;;  %25 = sbr.rel (!%p23_p5) target bundleno = 8 (0x8), region = 116 }
 0x434   :  { %2386 = vsyncpa [#allocation3], 1 }
 0x435   :  { %2388 = vsyncpa [#allocation3 + $0x1], 1 }
 0x436   :  { %2389 = vsyncpa [#allocation5], 1 }
 0x437   :  { %2391 = vsyncpa [#allocation5 + $0x1], 1 }

</bundles_post_ra>
